<compile_context>
chip_gen: v7x
topology: tpu7x:2x2x1
jax: 0.10.0
libtpu: 0.0.40
codegen_flags: <defaults>
</compile_context>

<pallas_src>
import jax
import jax.numpy as jnp
from jax.experimental import pallas as pl
from jax.experimental.pallas import tpu as pltpu

BN_EPS = 1e-5
NEG_SLOPE = 0.2


def _round_up(x, m):
    return (x + m - 1) // m * m


def _choose_band(H, W2, cap_rows=512):
    """Even band height TH dividing H with (TH//2)*W2 sublane-aligned and VMEM-friendly."""
    best = None
    for th in range(2, H + 1, 2):
        if H % th:
            continue
        rows = (th // 2) * W2
        if rows % 8 != 0 and th != H:
            continue
        if rows <= cap_rows:
            best = th
    if best is not None:
        return best
    for th in range(2, H + 1, 2):
        if H % th == 0 and ((th // 2) * W2) % 8 == 0:
            return th
    return H


def _conv_pool_stats_kernel(planes_ref, w_ref, ymax_ref, ymin_ref, stats_ref):
    """Pass 1.

    planes_ref: (16, Mb, Cin) bf16  -- 16 = 4x4 stride-2 polyphase planes of padded input
    w_ref:      (9, Cin, Cp)  bf16  -- conv taps (ky*3 + kx), Cout padded to Cp (128*k)
    ymax_ref:   (Mb, Cp)      f32   -- per 2x2-window max of the raw conv output
    ymin_ref:   (Mb, Cp)      f32   -- per 2x2-window min of the raw conv output
    stats_ref:  (2, Cp)       f32   -- per-band (sum, sum of squares) over all 4 positions
    """
    xs = [planes_ref[i] for i in range(16)]     # (Mb, Cin) bf16, loaded once
    ws = [w_ref[t] for t in range(9)]           # (Cin, Cp)  bf16, loaded once

    run_max = None
    run_min = None
    s_sum = None
    s_sq = None
    for dy in range(2):
        for dx in range(2):
            acc = None
            for ky in range(3):
                for kx in range(3):
                    u = dy + ky                 # row phase of the 4x4 footprint
                    v = dx + kx                 # col phase of the 4x4 footprint
                    p = jnp.dot(xs[u * 4 + v], ws[ky * 3 + kx],
                                preferred_element_type=jnp.float32)
                    acc = p if acc is None else acc + p
            run_max = acc if run_max is None else jnp.maximum(run_max, acc)
            run_min = acc if run_min is None else jnp.minimum(run_min, acc)
            ps = jnp.sum(acc, axis=0, keepdims=True)
            pq = jnp.sum(acc * acc, axis=0, keepdims=True)
            s_sum = ps if s_sum is None else s_sum + ps
            s_sq = pq if s_sq is None else s_sq + pq

    ymax_ref[...] = run_max
    ymin_ref[...] = run_min
    stats_ref[0:1, :] = s_sum
    stats_ref[1:2, :] = s_sq


def _bn_pool_act_kernel(scale_ref, shift_ref, ymax_ref, ymin_ref, out_ref):
    """Pass 2: single BN affine on the pre-pooled max/min (sign-selected) + LeakyReLU."""
    scale = scale_ref[...]                      # (1, Cp)
    shift = shift_ref[...]                      # (1, Cp)
    pooled = jnp.where(scale >= 0.0, ymax_ref[...], ymin_ref[...]) * scale + shift
    out_ref[...] = jnp.where(pooled >= 0.0, pooled, NEG_SLOPE * pooled)


def encoder_block(x_nchw, conv_w, conv_b, bn_gamma, bn_beta):
    """x_nchw: (N, Cin, H, W) f32 (PyTorch layout). Returns (N, Cout, H/2, W/2) f32."""
    del conv_b  # cancels exactly under training-mode BatchNorm (mean subtraction)
    N, Cin, H, W = x_nchw.shape
    Cout = conv_w.shape[0]
    assert H % 2 == 0 and W % 2 == 0, "MaxPool2d(2,2) needs even spatial dims"
    H2, W2 = H // 2, W // 2
    Cp = _round_up(Cout, 128)                   # lane-dense output channels

    TH = _choose_band(H, W2)                    # band height (in conv rows)
    n_hb = H // TH
    Mb = (TH // 2) * W2                         # pooled pixels per band (flattened)

    # ---------- plain-JAX glue: layout only ----------
    xh = jnp.transpose(x_nchw, (0, 2, 3, 1)).astype(jnp.float32)      # NHWC
    xp = jnp.pad(xh, ((0, 0), (1, 1), (1, 1), (0, 0)))                # conv padding = 1
    # planes[u*4+v][n, tp*W2 + wp, :] = xp[n, 2*tp + u, 2*wp + v, :]
    planes = jnp.stack([xp[:, u:u + H:2, v:v + W:2, :]
                        for u in range(4) for v in range(4)], axis=0)  # (16,N,H2,W2,Cin)
    planes = planes.reshape(16, N, H2 * W2, Cin).astype(jnp.bfloat16)

    wk = jnp.transpose(conv_w, (2, 3, 1, 0)).reshape(9, Cin, Cout).astype(jnp.float32)
    wk = jnp.pad(wk, ((0, 0), (0, 0), (0, Cp - Cout))).astype(jnp.bfloat16)

    grid = (N, n_hb)
    cparams = pltpu.CompilerParams(
        dimension_semantics=("parallel", "parallel"),
        vmem_limit_bytes=32 * 1024 * 1024,
    )

    # ---------- pass 1: conv (MXU) + window max/min + BN partial stats ----------
    ymax, ymin, stats = pl.pallas_call(
        _conv_pool_stats_kernel,
        out_shape=(
            jax.ShapeDtypeStruct((N, H2 * W2, Cp), jnp.float32),
            jax.ShapeDtypeStruct((N, H2 * W2, Cp), jnp.float32),
            jax.ShapeDtypeStruct((N, n_hb, 2, Cp), jnp.float32),
        ),
        grid=grid,
        in_specs=[
            pl.BlockSpec((16, None, Mb, Cin), lambda n, hb: (0, n, hb, 0)),
            pl.BlockSpec((9, Cin, Cp), lambda n, hb: (0, 0, 0)),
        ],
        out_specs=(
            pl.BlockSpec((None, Mb, Cp), lambda n, hb: (n, hb, 0)),
            pl.BlockSpec((None, Mb, Cp), lambda n, hb: (n, hb, 0)),
            pl.BlockSpec((None, None, 2, Cp), lambda n, hb: (n, hb, 0, 0)),
        ),
        compiler_params=cparams,
    )(planes, wk)

    # ---------- tiny cross-band reduction + BN affine coefficients (plain JAX) ----------
    count = jnp.float32(N * H * W)
    s = jnp.sum(stats[:, :, 0, :], axis=(0, 1))
    sq = jnp.sum(stats[:, :, 1, :], axis=(0, 1))
    mean = s / count
    # TODO(synk): sum-of-squares variance can cancel if |mean| >> std; a Welford-style
    #             combine over the per-band partials would be more robust.
    var = jnp.maximum(sq / count - mean * mean, 0.0)      # biased variance (PyTorch norm)
    gamma_p = jnp.pad(bn_gamma.astype(jnp.float32), (0, Cp - Cout), constant_values=1.0)
    beta_p = jnp.pad(bn_beta.astype(jnp.float32), (0, Cp - Cout))
    scale = gamma_p * jax.lax.rsqrt(var + BN_EPS)
    shift = beta_p - mean * scale
    scale = scale.reshape(1, Cp)
    shift = shift.reshape(1, Cp)

    # ---------- pass 2: BN affine + pooled-max/min select + LeakyReLU ----------
    out_flat = pl.pallas_call(
        _bn_pool_act_kernel,
        out_shape=jax.ShapeDtypeStruct((N, H2 * W2, Cp), jnp.float32),
        grid=grid,
        in_specs=[
            pl.BlockSpec((1, Cp), lambda n, hb: (0, 0)),
            pl.BlockSpec((1, Cp), lambda n, hb: (0, 0)),
            pl.BlockSpec((None, Mb, Cp), lambda n, hb: (n, hb, 0)),
            pl.BlockSpec((None, Mb, Cp), lambda n, hb: (n, hb, 0)),
        ],
        out_specs=pl.BlockSpec((None, Mb, Cp), lambda n, hb: (n, hb, 0)),
        compiler_params=cparams,
    )(scale, shift, ymax, ymin)

    out = out_flat.reshape(N, H2, W2, Cp)[..., :Cout]
    return jnp.transpose(out, (0, 3, 1, 2))                # back to NCHW


def encoder_block_reference(x_nchw, conv_w, conv_b, bn_gamma, bn_beta):
    """Pure-JAX reference mirroring the PyTorch forward (training-mode BN)."""
    y = jax.lax.conv_general_dilated(
        x_nchw, conv_w, window_strides=(1, 1), padding=((1, 1), (1, 1)),
        dimension_numbers=("NCHW", "OIHW", "NCHW"))
    y = y + conv_b[None, :, None, None]
    mean = jnp.mean(y, axis=(0, 2, 3), keepdims=True)
    var = jnp.mean((y - mean) ** 2, axis=(0, 2, 3), keepdims=True)
    y = (y - mean) * jax.lax.rsqrt(var + BN_EPS)
    y = y * bn_gamma[None, :, None, None] + bn_beta[None, :, None, None]
    N, C, H, W = y.shape
    y = y.reshape(N, C, H // 2, 2, W // 2, 2).max(axis=(3, 5))
    return jnp.where(y >= 0, y, NEG_SLOPE * y)


if __name__ == "__main__":
    key = jax.random.PRNGKey(0)
    k_x, k_w, k_b, k_g, k_beta = jax.random.split(key, 5)

    N, Cin, Cout, H, W = 2, 4, 8, 16, 16
    x = jax.random.normal(k_x, (N, Cin, H, W), dtype=jnp.float32)
    conv_w = 0.1 * jax.random.normal(k_w, (Cout, Cin, 3, 3), dtype=jnp.float32)
    conv_b = 0.1 * jax.random.normal(k_b, (Cout,), dtype=jnp.float32)
    bn_gamma = 1.0 + 0.2 * jax.random.normal(k_g, (Cout,), dtype=jnp.float32)
    bn_beta = 0.1 * jax.random.normal(k_beta, (Cout,), dtype=jnp.float32)

    out = jax.block_until_ready(encoder_block(x, conv_w, conv_b, bn_gamma, bn_beta))
    ref = jax.block_until_ready(encoder_block_reference(x, conv_w, conv_b, bn_gamma, bn_beta))

    assert out.shape == (N, Cout, H // 2, W // 2), out.shape
    max_err = float(jnp.max(jnp.abs(out - ref)))
    assert jnp.allclose(out, ref, atol=3e-2, rtol=3e-2), max_err

    print("KERNEL_OK")
</pallas_src>

<mosaic_0001>
module attributes {stable_mosaic.version = 11 : i64} {
  func.func @_conv_pool_stats_kernel(%arg0: i32, %arg1: i32, %arg2: memref<16x1x64x4xbf16, #tpu.memory_space<vmem>>, %arg3: memref<9x4x128xbf16, #tpu.memory_space<vmem>>, %arg4: memref<1x64x128xf32, #tpu.memory_space<vmem>>, %arg5: memref<1x64x128xf32, #tpu.memory_space<vmem>>, %arg6: memref<1x1x2x128xf32, #tpu.memory_space<vmem>>) attributes {dimension_semantics = [#tpu.dimension_semantics<parallel>, #tpu.dimension_semantics<parallel>], iteration_bounds = array<i64: 2, 1>, scalar_prefetch = 0 : i64, scratch_operands = 0 : i64, tpu.core_type = #tpu.core_type<tc>, window_params = [{transform_indices = @transform_0, window_bounds = array<i64: 16, 1, 64, 4>}, {pipeline_mode = #tpu.pipeline_mode<synchronous>, transform_indices = @transform_1, window_bounds = array<i64: 9, 4, 128>}, {transform_indices = @transform_2, window_bounds = array<i64: 1, 64, 128>}, {transform_indices = @transform_3, window_bounds = array<i64: 1, 64, 128>}, {transform_indices = @transform_4, window_bounds = array<i64: 1, 1, 2, 128>}]} {
    %c0 = arith.constant 0 : index
    %c0_0 = arith.constant 0 : index
    %c0_1 = arith.constant 0 : index
    %c0_2 = arith.constant 0 : index
    %0 = vector.load %arg2[%c0, %c0_0, %c0_1, %c0_2] : memref<16x1x64x4xbf16, #tpu.memory_space<vmem>>, vector<1x1x64x4xbf16>
    %1 = vector.shape_cast %0 : vector<1x1x64x4xbf16> to vector<64x4xbf16>
    %c1 = arith.constant 1 : index
    %c0_3 = arith.constant 0 : index
    %c0_4 = arith.constant 0 : index
    %c0_5 = arith.constant 0 : index
    %2 = vector.load %arg2[%c1, %c0_3, %c0_4, %c0_5] : memref<16x1x64x4xbf16, #tpu.memory_space<vmem>>, vector<1x1x64x4xbf16>
    %3 = vector.shape_cast %2 : vector<1x1x64x4xbf16> to vector<64x4xbf16>
    %c2 = arith.constant 2 : index
    %c0_6 = arith.constant 0 : index
    %c0_7 = arith.constant 0 : index
    %c0_8 = arith.constant 0 : index
    %4 = vector.load %arg2[%c2, %c0_6, %c0_7, %c0_8] : memref<16x1x64x4xbf16, #tpu.memory_space<vmem>>, vector<1x1x64x4xbf16>
    %5 = vector.shape_cast %4 : vector<1x1x64x4xbf16> to vector<64x4xbf16>
    %c3 = arith.constant 3 : index
    %c0_9 = arith.constant 0 : index
    %c0_10 = arith.constant 0 : index
    %c0_11 = arith.constant 0 : index
    %6 = vector.load %arg2[%c3, %c0_9, %c0_10, %c0_11] : memref<16x1x64x4xbf16, #tpu.memory_space<vmem>>, vector<1x1x64x4xbf16>
    %7 = vector.shape_cast %6 : vector<1x1x64x4xbf16> to vector<64x4xbf16>
    %c4 = arith.constant 4 : index
    %c0_12 = arith.constant 0 : index
    %c0_13 = arith.constant 0 : index
    %c0_14 = arith.constant 0 : index
    %8 = vector.load %arg2[%c4, %c0_12, %c0_13, %c0_14] : memref<16x1x64x4xbf16, #tpu.memory_space<vmem>>, vector<1x1x64x4xbf16>
    %9 = vector.shape_cast %8 : vector<1x1x64x4xbf16> to vector<64x4xbf16>
    %c5 = arith.constant 5 : index
    %c0_15 = arith.constant 0 : index
    %c0_16 = arith.constant 0 : index
    %c0_17 = arith.constant 0 : index
    %10 = vector.load %arg2[%c5, %c0_15, %c0_16, %c0_17] : memref<16x1x64x4xbf16, #tpu.memory_space<vmem>>, vector<1x1x64x4xbf16>
    %11 = vector.shape_cast %10 : vector<1x1x64x4xbf16> to vector<64x4xbf16>
    %c6 = arith.constant 6 : index
    %c0_18 = arith.constant 0 : index
    %c0_19 = arith.constant 0 : index
    %c0_20 = arith.constant 0 : index
    %12 = vector.load %arg2[%c6, %c0_18, %c0_19, %c0_20] : memref<16x1x64x4xbf16, #tpu.memory_space<vmem>>, vector<1x1x64x4xbf16>
    %13 = vector.shape_cast %12 : vector<1x1x64x4xbf16> to vector<64x4xbf16>
    %c7 = arith.constant 7 : index
    %c0_21 = arith.constant 0 : index
    %c0_22 = arith.constant 0 : index
    %c0_23 = arith.constant 0 : index
    %14 = vector.load %arg2[%c7, %c0_21, %c0_22, %c0_23] : memref<16x1x64x4xbf16, #tpu.memory_space<vmem>>, vector<1x1x64x4xbf16>
    %15 = vector.shape_cast %14 : vector<1x1x64x4xbf16> to vector<64x4xbf16>
    %c8 = arith.constant 8 : index
    %c0_24 = arith.constant 0 : index
    %c0_25 = arith.constant 0 : index
    %c0_26 = arith.constant 0 : index
    %16 = vector.load %arg2[%c8, %c0_24, %c0_25, %c0_26] : memref<16x1x64x4xbf16, #tpu.memory_space<vmem>>, vector<1x1x64x4xbf16>
    %17 = vector.shape_cast %16 : vector<1x1x64x4xbf16> to vector<64x4xbf16>
    %c9 = arith.constant 9 : index
    %c0_27 = arith.constant 0 : index
    %c0_28 = arith.constant 0 : index
    %c0_29 = arith.constant 0 : index
    %18 = vector.load %arg2[%c9, %c0_27, %c0_28, %c0_29] : memref<16x1x64x4xbf16, #tpu.memory_space<vmem>>, vector<1x1x64x4xbf16>
    %19 = vector.shape_cast %18 : vector<1x1x64x4xbf16> to vector<64x4xbf16>
    %c10 = arith.constant 10 : index
    %c0_30 = arith.constant 0 : index
    %c0_31 = arith.constant 0 : index
    %c0_32 = arith.constant 0 : index
    %20 = vector.load %arg2[%c10, %c0_30, %c0_31, %c0_32] : memref<16x1x64x4xbf16, #tpu.memory_space<vmem>>, vector<1x1x64x4xbf16>
    %21 = vector.shape_cast %20 : vector<1x1x64x4xbf16> to vector<64x4xbf16>
    %c11 = arith.constant 11 : index
    %c0_33 = arith.constant 0 : index
    %c0_34 = arith.constant 0 : index
    %c0_35 = arith.constant 0 : index
    %22 = vector.load %arg2[%c11, %c0_33, %c0_34, %c0_35] : memref<16x1x64x4xbf16, #tpu.memory_space<vmem>>, vector<1x1x64x4xbf16>
    %23 = vector.shape_cast %22 : vector<1x1x64x4xbf16> to vector<64x4xbf16>
    %c12 = arith.constant 12 : index
    %c0_36 = arith.constant 0 : index
    %c0_37 = arith.constant 0 : index
    %c0_38 = arith.constant 0 : index
    %24 = vector.load %arg2[%c12, %c0_36, %c0_37, %c0_38] : memref<16x1x64x4xbf16, #tpu.memory_space<vmem>>, vector<1x1x64x4xbf16>
    %25 = vector.shape_cast %24 : vector<1x1x64x4xbf16> to vector<64x4xbf16>
    %c13 = arith.constant 13 : index
    %c0_39 = arith.constant 0 : index
    %c0_40 = arith.constant 0 : index
    %c0_41 = arith.constant 0 : index
    %26 = vector.load %arg2[%c13, %c0_39, %c0_40, %c0_41] : memref<16x1x64x4xbf16, #tpu.memory_space<vmem>>, vector<1x1x64x4xbf16>
    %27 = vector.shape_cast %26 : vector<1x1x64x4xbf16> to vector<64x4xbf16>
    %c14 = arith.constant 14 : index
    %c0_42 = arith.constant 0 : index
    %c0_43 = arith.constant 0 : index
    %c0_44 = arith.constant 0 : index
    %28 = vector.load %arg2[%c14, %c0_42, %c0_43, %c0_44] : memref<16x1x64x4xbf16, #tpu.memory_space<vmem>>, vector<1x1x64x4xbf16>
    %29 = vector.shape_cast %28 : vector<1x1x64x4xbf16> to vector<64x4xbf16>
    %c15 = arith.constant 15 : index
    %c0_45 = arith.constant 0 : index
    %c0_46 = arith.constant 0 : index
    %c0_47 = arith.constant 0 : index
    %30 = vector.load %arg2[%c15, %c0_45, %c0_46, %c0_47] : memref<16x1x64x4xbf16, #tpu.memory_space<vmem>>, vector<1x1x64x4xbf16>
    %31 = vector.shape_cast %30 : vector<1x1x64x4xbf16> to vector<64x4xbf16>
    %c0_48 = arith.constant 0 : index
    %c0_49 = arith.constant 0 : index
    %c0_50 = arith.constant 0 : index
    %32 = vector.load %arg3[%c0_48, %c0_49, %c0_50] : memref<9x4x128xbf16, #tpu.memory_space<vmem>>, vector<1x4x128xbf16>
    %33 = vector.shape_cast %32 : vector<1x4x128xbf16> to vector<4x128xbf16>
    %c1_51 = arith.constant 1 : index
    %c0_52 = arith.constant 0 : index
    %c0_53 = arith.constant 0 : index
    %34 = vector.load %arg3[%c1_51, %c0_52, %c0_53] : memref<9x4x128xbf16, #tpu.memory_space<vmem>>, vector<1x4x128xbf16>
    %35 = vector.shape_cast %34 : vector<1x4x128xbf16> to vector<4x128xbf16>
    %c2_54 = arith.constant 2 : index
    %c0_55 = arith.constant 0 : index
    %c0_56 = arith.constant 0 : index
    %36 = vector.load %arg3[%c2_54, %c0_55, %c0_56] : memref<9x4x128xbf16, #tpu.memory_space<vmem>>, vector<1x4x128xbf16>
    %37 = vector.shape_cast %36 : vector<1x4x128xbf16> to vector<4x128xbf16>
    %c3_57 = arith.constant 3 : index
    %c0_58 = arith.constant 0 : index
    %c0_59 = arith.constant 0 : index
    %38 = vector.load %arg3[%c3_57, %c0_58, %c0_59] : memref<9x4x128xbf16, #tpu.memory_space<vmem>>, vector<1x4x128xbf16>
    %39 = vector.shape_cast %38 : vector<1x4x128xbf16> to vector<4x128xbf16>
    %c4_60 = arith.constant 4 : index
    %c0_61 = arith.constant 0 : index
    %c0_62 = arith.constant 0 : index
    %40 = vector.load %arg3[%c4_60, %c0_61, %c0_62] : memref<9x4x128xbf16, #tpu.memory_space<vmem>>, vector<1x4x128xbf16>
    %41 = vector.shape_cast %40 : vector<1x4x128xbf16> to vector<4x128xbf16>
    %c5_63 = arith.constant 5 : index
    %c0_64 = arith.constant 0 : index
    %c0_65 = arith.constant 0 : index
    %42 = vector.load %arg3[%c5_63, %c0_64, %c0_65] : memref<9x4x128xbf16, #tpu.memory_space<vmem>>, vector<1x4x128xbf16>
    %43 = vector.shape_cast %42 : vector<1x4x128xbf16> to vector<4x128xbf16>
    %c6_66 = arith.constant 6 : index
    %c0_67 = arith.constant 0 : index
    %c0_68 = arith.constant 0 : index
    %44 = vector.load %arg3[%c6_66, %c0_67, %c0_68] : memref<9x4x128xbf16, #tpu.memory_space<vmem>>, vector<1x4x128xbf16>
    %45 = vector.shape_cast %44 : vector<1x4x128xbf16> to vector<4x128xbf16>
    %c7_69 = arith.constant 7 : index
    %c0_70 = arith.constant 0 : index
    %c0_71 = arith.constant 0 : index
    %46 = vector.load %arg3[%c7_69, %c0_70, %c0_71] : memref<9x4x128xbf16, #tpu.memory_space<vmem>>, vector<1x4x128xbf16>
    %47 = vector.shape_cast %46 : vector<1x4x128xbf16> to vector<4x128xbf16>
    %c8_72 = arith.constant 8 : index
    %c0_73 = arith.constant 0 : index
    %c0_74 = arith.constant 0 : index
    %48 = vector.load %arg3[%c8_72, %c0_73, %c0_74] : memref<9x4x128xbf16, #tpu.memory_space<vmem>>, vector<1x4x128xbf16>
    %49 = vector.shape_cast %48 : vector<1x4x128xbf16> to vector<4x128xbf16>
    %cst = arith.constant dense<0.000000e+00> : vector<64x128xf32>
    %50 = tpu.matmul %1, %33, %cst {dimension_numbers = #tpu.dot_dimension_numbers<[1], [0], [0], [1], [0, 0, 1, 1], [], []>} : vector<64x4xbf16>, vector<4x128xbf16>, vector<64x128xf32> -> vector<64x128xf32>
    %cst_75 = arith.constant dense<0.000000e+00> : vector<64x128xf32>
    %51 = tpu.matmul %3, %35, %cst_75 {dimension_numbers = #tpu.dot_dimension_numbers<[1], [0], [0], [1], [0, 0, 1, 1], [], []>} : vector<64x4xbf16>, vector<4x128xbf16>, vector<64x128xf32> -> vector<64x128xf32>
    %52 = arith.addf %50, %51 : vector<64x128xf32>
    %cst_76 = arith.constant dense<0.000000e+00> : vector<64x128xf32>
    %53 = tpu.matmul %5, %37, %cst_76 {dimension_numbers = #tpu.dot_dimension_numbers<[1], [0], [0], [1], [0, 0, 1, 1], [], []>} : vector<64x4xbf16>, vector<4x128xbf16>, vector<64x128xf32> -> vector<64x128xf32>
    %54 = arith.addf %52, %53 : vector<64x128xf32>
    %cst_77 = arith.constant dense<0.000000e+00> : vector<64x128xf32>
    %55 = tpu.matmul %9, %39, %cst_77 {dimension_numbers = #tpu.dot_dimension_numbers<[1], [0], [0], [1], [0, 0, 1, 1], [], []>} : vector<64x4xbf16>, vector<4x128xbf16>, vector<64x128xf32> -> vector<64x128xf32>
    %56 = arith.addf %54, %55 : vector<64x128xf32>
    %cst_78 = arith.constant dense<0.000000e+00> : vector<64x128xf32>
    %57 = tpu.matmul %11, %41, %cst_78 {dimension_numbers = #tpu.dot_dimension_numbers<[1], [0], [0], [1], [0, 0, 1, 1], [], []>} : vector<64x4xbf16>, vector<4x128xbf16>, vector<64x128xf32> -> vector<64x128xf32>
    %58 = arith.addf %56, %57 : vector<64x128xf32>
    %cst_79 = arith.constant dense<0.000000e+00> : vector<64x128xf32>
    %59 = tpu.matmul %13, %43, %cst_79 {dimension_numbers = #tpu.dot_dimension_numbers<[1], [0], [0], [1], [0, 0, 1, 1], [], []>} : vector<64x4xbf16>, vector<4x128xbf16>, vector<64x128xf32> -> vector<64x128xf32>
    %60 = arith.addf %58, %59 : vector<64x128xf32>
    %cst_80 = arith.constant dense<0.000000e+00> : vector<64x128xf32>
    %61 = tpu.matmul %17, %45, %cst_80 {dimension_numbers = #tpu.dot_dimension_numbers<[1], [0], [0], [1], [0, 0, 1, 1], [], []>} : vector<64x4xbf16>, vector<4x128xbf16>, vector<64x128xf32> -> vector<64x128xf32>
    %62 = arith.addf %60, %61 : vector<64x128xf32>
    %cst_81 = arith.constant dense<0.000000e+00> : vector<64x128xf32>
    %63 = tpu.matmul %19, %47, %cst_81 {dimension_numbers = #tpu.dot_dimension_numbers<[1], [0], [0], [1], [0, 0, 1, 1], [], []>} : vector<64x4xbf16>, vector<4x128xbf16>, vector<64x128xf32> -> vector<64x128xf32>
    %64 = arith.addf %62, %63 : vector<64x128xf32>
    %cst_82 = arith.constant dense<0.000000e+00> : vector<64x128xf32>
    %65 = tpu.matmul %21, %49, %cst_82 {dimension_numbers = #tpu.dot_dimension_numbers<[1], [0], [0], [1], [0, 0, 1, 1], [], []>} : vector<64x4xbf16>, vector<4x128xbf16>, vector<64x128xf32> -> vector<64x128xf32>
    %66 = arith.addf %64, %65 : vector<64x128xf32>
    %cst_83 = arith.constant dense<0.000000e+00> : vector<128xf32>
    %67 = vector.multi_reduction <add>, %66, %cst_83 [0] : vector<64x128xf32> to vector<128xf32>
    %68 = vector.shape_cast %67 : vector<128xf32> to vector<1x128xf32>
    %69 = arith.mulf %66, %66 : vector<64x128xf32>
    %cst_84 = arith.constant dense<0.000000e+00> : vector<128xf32>
    %70 = vector.multi_reduction <add>, %69, %cst_84 [0] : vector<64x128xf32> to vector<128xf32>
    %71 = vector.shape_cast %70 : vector<128xf32> to vector<1x128xf32>
    %cst_85 = arith.constant dense<0.000000e+00> : vector<64x128xf32>
    %72 = tpu.matmul %3, %33, %cst_85 {dimension_numbers = #tpu.dot_dimension_numbers<[1], [0], [0], [1], [0, 0, 1, 1], [], []>} : vector<64x4xbf16>, vector<4x128xbf16>, vector<64x128xf32> -> vector<64x128xf32>
    %cst_86 = arith.constant dense<0.000000e+00> : vector<64x128xf32>
    %73 = tpu.matmul %5, %35, %cst_86 {dimension_numbers = #tpu.dot_dimension_numbers<[1], [0], [0], [1], [0, 0, 1, 1], [], []>} : vector<64x4xbf16>, vector<4x128xbf16>, vector<64x128xf32> -> vector<64x128xf32>
    %74 = arith.addf %72, %73 : vector<64x128xf32>
    %cst_87 = arith.constant dense<0.000000e+00> : vector<64x128xf32>
    %75 = tpu.matmul %7, %37, %cst_87 {dimension_numbers = #tpu.dot_dimension_numbers<[1], [0], [0], [1], [0, 0, 1, 1], [], []>} : vector<64x4xbf16>, vector<4x128xbf16>, vector<64x128xf32> -> vector<64x128xf32>
    %76 = arith.addf %74, %75 : vector<64x128xf32>
    %cst_88 = arith.constant dense<0.000000e+00> : vector<64x128xf32>
    %77 = tpu.matmul %11, %39, %cst_88 {dimension_numbers = #tpu.dot_dimension_numbers<[1], [0], [0], [1], [0, 0, 1, 1], [], []>} : vector<64x4xbf16>, vector<4x128xbf16>, vector<64x128xf32> -> vector<64x128xf32>
    %78 = arith.addf %76, %77 : vector<64x128xf32>
    %cst_89 = arith.constant dense<0.000000e+00> : vector<64x128xf32>
    %79 = tpu.matmul %13, %41, %cst_89 {dimension_numbers = #tpu.dot_dimension_numbers<[1], [0], [0], [1], [0, 0, 1, 1], [], []>} : vector<64x4xbf16>, vector<4x128xbf16>, vector<64x128xf32> -> vector<64x128xf32>
    %80 = arith.addf %78, %79 : vector<64x128xf32>
    %cst_90 = arith.constant dense<0.000000e+00> : vector<64x128xf32>
    %81 = tpu.matmul %15, %43, %cst_90 {dimension_numbers = #tpu.dot_dimension_numbers<[1], [0], [0], [1], [0, 0, 1, 1], [], []>} : vector<64x4xbf16>, vector<4x128xbf16>, vector<64x128xf32> -> vector<64x128xf32>
    %82 = arith.addf %80, %81 : vector<64x128xf32>
    %cst_91 = arith.constant dense<0.000000e+00> : vector<64x128xf32>
    %83 = tpu.matmul %19, %45, %cst_91 {dimension_numbers = #tpu.dot_dimension_numbers<[1], [0], [0], [1], [0, 0, 1, 1], [], []>} : vector<64x4xbf16>, vector<4x128xbf16>, vector<64x128xf32> -> vector<64x128xf32>
    %84 = arith.addf %82, %83 : vector<64x128xf32>
    %cst_92 = arith.constant dense<0.000000e+00> : vector<64x128xf32>
    %85 = tpu.matmul %21, %47, %cst_92 {dimension_numbers = #tpu.dot_dimension_numbers<[1], [0], [0], [1], [0, 0, 1, 1], [], []>} : vector<64x4xbf16>, vector<4x128xbf16>, vector<64x128xf32> -> vector<64x128xf32>
    %86 = arith.addf %84, %85 : vector<64x128xf32>
    %cst_93 = arith.constant dense<0.000000e+00> : vector<64x128xf32>
    %87 = tpu.matmul %23, %49, %cst_93 {dimension_numbers = #tpu.dot_dimension_numbers<[1], [0], [0], [1], [0, 0, 1, 1], [], []>} : vector<64x4xbf16>, vector<4x128xbf16>, vector<64x128xf32> -> vector<64x128xf32>
    %88 = arith.addf %86, %87 : vector<64x128xf32>
    %89 = arith.maximumf %66, %88 : vector<64x128xf32>
    %90 = arith.minimumf %66, %88 : vector<64x128xf32>
    %cst_94 = arith.constant dense<0.000000e+00> : vector<128xf32>
    %91 = vector.multi_reduction <add>, %88, %cst_94 [0] : vector<64x128xf32> to vector<128xf32>
    %92 = vector.shape_cast %91 : vector<128xf32> to vector<1x128xf32>
    %93 = arith.mulf %88, %88 : vector<64x128xf32>
    %cst_95 = arith.constant dense<0.000000e+00> : vector<128xf32>
    %94 = vector.multi_reduction <add>, %93, %cst_95 [0] : vector<64x128xf32> to vector<128xf32>
    %95 = vector.shape_cast %94 : vector<128xf32> to vector<1x128xf32>
    %96 = arith.addf %68, %92 : vector<1x128xf32>
    %97 = arith.addf %71, %95 : vector<1x128xf32>
    %cst_96 = arith.constant dense<0.000000e+00> : vector<64x128xf32>
    %98 = tpu.matmul %9, %33, %cst_96 {dimension_numbers = #tpu.dot_dimension_numbers<[1], [0], [0], [1], [0, 0, 1, 1], [], []>} : vector<64x4xbf16>, vector<4x128xbf16>, vector<64x128xf32> -> vector<64x128xf32>
    %cst_97 = arith.constant dense<0.000000e+00> : vector<64x128xf32>
    %99 = tpu.matmul %11, %35, %cst_97 {dimension_numbers = #tpu.dot_dimension_numbers<[1], [0], [0], [1], [0, 0, 1, 1], [], []>} : vector<64x4xbf16>, vector<4x128xbf16>, vector<64x128xf32> -> vector<64x128xf32>
    %100 = arith.addf %98, %99 : vector<64x128xf32>
    %cst_98 = arith.constant dense<0.000000e+00> : vector<64x128xf32>
    %101 = tpu.matmul %13, %37, %cst_98 {dimension_numbers = #tpu.dot_dimension_numbers<[1], [0], [0], [1], [0, 0, 1, 1], [], []>} : vector<64x4xbf16>, vector<4x128xbf16>, vector<64x128xf32> -> vector<64x128xf32>
    %102 = arith.addf %100, %101 : vector<64x128xf32>
    %cst_99 = arith.constant dense<0.000000e+00> : vector<64x128xf32>
    %103 = tpu.matmul %17, %39, %cst_99 {dimension_numbers = #tpu.dot_dimension_numbers<[1], [0], [0], [1], [0, 0, 1, 1], [], []>} : vector<64x4xbf16>, vector<4x128xbf16>, vector<64x128xf32> -> vector<64x128xf32>
    %104 = arith.addf %102, %103 : vector<64x128xf32>
    %cst_100 = arith.constant dense<0.000000e+00> : vector<64x128xf32>
    %105 = tpu.matmul %19, %41, %cst_100 {dimension_numbers = #tpu.dot_dimension_numbers<[1], [0], [0], [1], [0, 0, 1, 1], [], []>} : vector<64x4xbf16>, vector<4x128xbf16>, vector<64x128xf32> -> vector<64x128xf32>
    %106 = arith.addf %104, %105 : vector<64x128xf32>
    %cst_101 = arith.constant dense<0.000000e+00> : vector<64x128xf32>
    %107 = tpu.matmul %21, %43, %cst_101 {dimension_numbers = #tpu.dot_dimension_numbers<[1], [0], [0], [1], [0, 0, 1, 1], [], []>} : vector<64x4xbf16>, vector<4x128xbf16>, vector<64x128xf32> -> vector<64x128xf32>
    %108 = arith.addf %106, %107 : vector<64x128xf32>
    %cst_102 = arith.constant dense<0.000000e+00> : vector<64x128xf32>
    %109 = tpu.matmul %25, %45, %cst_102 {dimension_numbers = #tpu.dot_dimension_numbers<[1], [0], [0], [1], [0, 0, 1, 1], [], []>} : vector<64x4xbf16>, vector<4x128xbf16>, vector<64x128xf32> -> vector<64x128xf32>
    %110 = arith.addf %108, %109 : vector<64x128xf32>
    %cst_103 = arith.constant dense<0.000000e+00> : vector<64x128xf32>
    %111 = tpu.matmul %27, %47, %cst_103 {dimension_numbers = #tpu.dot_dimension_numbers<[1], [0], [0], [1], [0, 0, 1, 1], [], []>} : vector<64x4xbf16>, vector<4x128xbf16>, vector<64x128xf32> -> vector<64x128xf32>
    %112 = arith.addf %110, %111 : vector<64x128xf32>
    %cst_104 = arith.constant dense<0.000000e+00> : vector<64x128xf32>
    %113 = tpu.matmul %29, %49, %cst_104 {dimension_numbers = #tpu.dot_dimension_numbers<[1], [0], [0], [1], [0, 0, 1, 1], [], []>} : vector<64x4xbf16>, vector<4x128xbf16>, vector<64x128xf32> -> vector<64x128xf32>
    %114 = arith.addf %112, %113 : vector<64x128xf32>
    %115 = arith.maximumf %89, %114 : vector<64x128xf32>
    %116 = arith.minimumf %90, %114 : vector<64x128xf32>
    %cst_105 = arith.constant dense<0.000000e+00> : vector<128xf32>
    %117 = vector.multi_reduction <add>, %114, %cst_105 [0] : vector<64x128xf32> to vector<128xf32>
    %118 = vector.shape_cast %117 : vector<128xf32> to vector<1x128xf32>
    %119 = arith.mulf %114, %114 : vector<64x128xf32>
    %cst_106 = arith.constant dense<0.000000e+00> : vector<128xf32>
    %120 = vector.multi_reduction <add>, %119, %cst_106 [0] : vector<64x128xf32> to vector<128xf32>
    %121 = vector.shape_cast %120 : vector<128xf32> to vector<1x128xf32>
    %122 = arith.addf %96, %118 : vector<1x128xf32>
    %123 = arith.addf %97, %121 : vector<1x128xf32>
    %cst_107 = arith.constant dense<0.000000e+00> : vector<64x128xf32>
    %124 = tpu.matmul %11, %33, %cst_107 {dimension_numbers = #tpu.dot_dimension_numbers<[1], [0], [0], [1], [0, 0, 1, 1], [], []>} : vector<64x4xbf16>, vector<4x128xbf16>, vector<64x128xf32> -> vector<64x128xf32>
    %cst_108 = arith.constant dense<0.000000e+00> : vector<64x128xf32>
    %125 = tpu.matmul %13, %35, %cst_108 {dimension_numbers = #tpu.dot_dimension_numbers<[1], [0], [0], [1], [0, 0, 1, 1], [], []>} : vector<64x4xbf16>, vector<4x128xbf16>, vector<64x128xf32> -> vector<64x128xf32>
    %126 = arith.addf %124, %125 : vector<64x128xf32>
    %cst_109 = arith.constant dense<0.000000e+00> : vector<64x128xf32>
    %127 = tpu.matmul %15, %37, %cst_109 {dimension_numbers = #tpu.dot_dimension_numbers<[1], [0], [0], [1], [0, 0, 1, 1], [], []>} : vector<64x4xbf16>, vector<4x128xbf16>, vector<64x128xf32> -> vector<64x128xf32>
    %128 = arith.addf %126, %127 : vector<64x128xf32>
    %cst_110 = arith.constant dense<0.000000e+00> : vector<64x128xf32>
    %129 = tpu.matmul %19, %39, %cst_110 {dimension_numbers = #tpu.dot_dimension_numbers<[1], [0], [0], [1], [0, 0, 1, 1], [], []>} : vector<64x4xbf16>, vector<4x128xbf16>, vector<64x128xf32> -> vector<64x128xf32>
    %130 = arith.addf %128, %129 : vector<64x128xf32>
    %cst_111 = arith.constant dense<0.000000e+00> : vector<64x128xf32>
    %131 = tpu.matmul %21, %41, %cst_111 {dimension_numbers = #tpu.dot_dimension_numbers<[1], [0], [0], [1], [0, 0, 1, 1], [], []>} : vector<64x4xbf16>, vector<4x128xbf16>, vector<64x128xf32> -> vector<64x128xf32>
    %132 = arith.addf %130, %131 : vector<64x128xf32>
    %cst_112 = arith.constant dense<0.000000e+00> : vector<64x128xf32>
    %133 = tpu.matmul %23, %43, %cst_112 {dimension_numbers = #tpu.dot_dimension_numbers<[1], [0], [0], [1], [0, 0, 1, 1], [], []>} : vector<64x4xbf16>, vector<4x128xbf16>, vector<64x128xf32> -> vector<64x128xf32>
    %134 = arith.addf %132, %133 : vector<64x128xf32>
    %cst_113 = arith.constant dense<0.000000e+00> : vector<64x128xf32>
    %135 = tpu.matmul %27, %45, %cst_113 {dimension_numbers = #tpu.dot_dimension_numbers<[1], [0], [0], [1], [0, 0, 1, 1], [], []>} : vector<64x4xbf16>, vector<4x128xbf16>, vector<64x128xf32> -> vector<64x128xf32>
    %136 = arith.addf %134, %135 : vector<64x128xf32>
    %cst_114 = arith.constant dense<0.000000e+00> : vector<64x128xf32>
    %137 = tpu.matmul %29, %47, %cst_114 {dimension_numbers = #tpu.dot_dimension_numbers<[1], [0], [0], [1], [0, 0, 1, 1], [], []>} : vector<64x4xbf16>, vector<4x128xbf16>, vector<64x128xf32> -> vector<64x128xf32>
    %138 = arith.addf %136, %137 : vector<64x128xf32>
    %cst_115 = arith.constant dense<0.000000e+00> : vector<64x128xf32>
    %139 = tpu.matmul %31, %49, %cst_115 {dimension_numbers = #tpu.dot_dimension_numbers<[1], [0], [0], [1], [0, 0, 1, 1], [], []>} : vector<64x4xbf16>, vector<4x128xbf16>, vector<64x128xf32> -> vector<64x128xf32>
    %140 = arith.addf %138, %139 : vector<64x128xf32>
    %141 = arith.maximumf %115, %140 : vector<64x128xf32>
    %142 = arith.minimumf %116, %140 : vector<64x128xf32>
    %cst_116 = arith.constant dense<0.000000e+00> : vector<128xf32>
    %143 = vector.multi_reduction <add>, %140, %cst_116 [0] : vector<64x128xf32> to vector<128xf32>
    %144 = vector.shape_cast %143 : vector<128xf32> to vector<1x128xf32>
    %145 = arith.mulf %140, %140 : vector<64x128xf32>
    %cst_117 = arith.constant dense<0.000000e+00> : vector<128xf32>
    %146 = vector.multi_reduction <add>, %145, %cst_117 [0] : vector<64x128xf32> to vector<128xf32>
    %147 = vector.shape_cast %146 : vector<128xf32> to vector<1x128xf32>
    %148 = arith.addf %122, %144 : vector<1x128xf32>
    %149 = arith.addf %123, %147 : vector<1x128xf32>
    %c0_118 = arith.constant 0 : index
    %c0_119 = arith.constant 0 : index
    %c0_120 = arith.constant 0 : index
    %150 = vector.load %arg4[%c0_118, %c0_119, %c0_120] : memref<1x64x128xf32, #tpu.memory_space<vmem>>, vector<1x64x128xf32>
    %151 = vector.shape_cast %150 : vector<1x64x128xf32> to vector<64x128xf32>
    %152 = vector.shape_cast %141 : vector<64x128xf32> to vector<1x64x128xf32>
    tpu.vector_store %arg4[%c0_118, %c0_119, %c0_120], %152 {strides = array<i32>} : memref<1x64x128xf32, #tpu.memory_space<vmem>>, vector<1x64x128xf32>,
    %c0_121 = arith.constant 0 : index
    %c0_122 = arith.constant 0 : index
    %c0_123 = arith.constant 0 : index
    %153 = vector.load %arg5[%c0_121, %c0_122, %c0_123] : memref<1x64x128xf32, #tpu.memory_space<vmem>>, vector<1x64x128xf32>
    %154 = vector.shape_cast %153 : vector<1x64x128xf32> to vector<64x128xf32>
    %155 = vector.shape_cast %142 : vector<64x128xf32> to vector<1x64x128xf32>
    tpu.vector_store %arg5[%c0_121, %c0_122, %c0_123], %155 {strides = array<i32>} : memref<1x64x128xf32, #tpu.memory_space<vmem>>, vector<1x64x128xf32>,
    %c0_124 = arith.constant 0 : index
    %c0_125 = arith.constant 0 : index
    %c0_126 = arith.constant 0 : index
    %c0_127 = arith.constant 0 : index
    %156 = vector.load %arg6[%c0_124, %c0_125, %c0_126, %c0_127] : memref<1x1x2x128xf32, #tpu.memory_space<vmem>>, vector<1x1x1x128xf32>
    %157 = vector.shape_cast %156 : vector<1x1x1x128xf32> to vector<1x128xf32>
    %158 = vector.shape_cast %148 : vector<1x128xf32> to vector<1x1x1x128xf32>
    tpu.vector_store %arg6[%c0_124, %c0_125, %c0_126, %c0_127], %158 {strides = array<i32>} : memref<1x1x2x128xf32, #tpu.memory_space<vmem>>, vector<1x1x1x128xf32>,
    %c0_128 = arith.constant 0 : index
    %c0_129 = arith.constant 0 : index
    %c1_130 = arith.constant 1 : index
    %c0_131 = arith.constant 0 : index
    %159 = vector.load %arg6[%c0_128, %c0_129, %c1_130, %c0_131] : memref<1x1x2x128xf32, #tpu.memory_space<vmem>>, vector<1x1x1x128xf32>
    %160 = vector.shape_cast %159 : vector<1x1x1x128xf32> to vector<1x128xf32>
    %161 = vector.shape_cast %149 : vector<1x128xf32> to vector<1x1x1x128xf32>
    tpu.vector_store %arg6[%c0_128, %c0_129, %c1_130, %c0_131], %161 {strides = array<i32>} : memref<1x1x2x128xf32, #tpu.memory_space<vmem>>, vector<1x1x1x128xf32>,
    return
  }
  func.func @transform_0(%arg0: i32, %arg1: i32) -> (i32, i32, i32, i32) {
    %c0_i32 = arith.constant 0 : i32
    %c0_i32_0 = arith.constant 0 : i32
    %c0_i32_1 = arith.constant 0 : i32
    return %c0_i32, %arg0, %arg1, %c0_i32_0 : i32, i32, i32, i32
  }
  func.func @transform_1(%arg0: i32, %arg1: i32) -> (i32, i32, i32) {
    %c0_i32 = arith.constant 0 : i32
    %c0_i32_0 = arith.constant 0 : i32
    %c0_i32_1 = arith.constant 0 : i32
    %c0_i32_2 = arith.constant 0 : i32
    return %c0_i32, %c0_i32_0, %c0_i32_1 : i32, i32, i32
  }
  func.func @transform_2(%arg0: i32, %arg1: i32) -> (i32, i32, i32) {
    %c0_i32 = arith.constant 0 : i32
    %c0_i32_0 = arith.constant 0 : i32
    return %arg0, %arg1, %c0_i32 : i32, i32, i32
  }
  func.func @transform_3(%arg0: i32, %arg1: i32) -> (i32, i32, i32) {
    %c0_i32 = arith.constant 0 : i32
    %c0_i32_0 = arith.constant 0 : i32
    return %arg0, %arg1, %c0_i32 : i32, i32, i32
  }
  func.func @transform_4(%arg0: i32, %arg1: i32) -> (i32, i32, i32, i32) {
    %c0_i32 = arith.constant 0 : i32
    %c0_i32_0 = arith.constant 0 : i32
    %c0_i32_1 = arith.constant 0 : i32
    return %arg0, %arg1, %c0_i32, %c0_i32_0 : i32, i32, i32, i32
  }
}

</mosaic_0001>

<bundles_post_ra>
// kernel: tpu_custom_call.1
= control target key start
LH: loop header
LB: loop body
LE: loop exit
PB: predicated region body
PF: predicated region fallthrough
CT: control target
= control target key end

     0   :  { %10 = vsyncpa [#allocation4], 0  ;;  %s7106_s0 = inlined_call_operand.vmem [shape: bf16[16,2,64,4], index: 0, kind: input, shape index: {}]   ;;  %s7107_s1 = inlined_call_operand.vmem [shape: bf16[9,4,128], index: 1, kind: input, shape index: {}]   ;;  %s7108_s2 = inlined_call_operand.hbm [shape: f32[2,64,128], index: 2, kind: output, shape index: {0}]   ;;  %s7109_s3 = inlined_call_operand.hbm [shape: f32[2,64,128], index: 3, kind: output, shape index: {1}]   ;;  %s7110_s4 = inlined_call_operand.hbm [shape: f32[2,1,2,128], index: 4, kind: output, shape index: {2}]  }
   0x1   :  { %12 = vsyncpa [#allocation4 + $0x1], 0 }
   0x2   :  { %13 = vsyncpa [#allocation6], 0 }
   0x3   :  { %15 = vsyncpa [#allocation6 + $0x1], 0  ;;  %s5962_s15 = smov 0   ;;  %s5964_s16 = smov 0  }
   0x4   :  { %s5966_s17 = smov 0   ;;  %s5968_s18 = smov 0  }
   0x5   :  { %s5970_s19 = smov 0   ;;  %s5972_s20 = smov 0  }
   0x6 LB: > { %s4468_s21 = sadd.s32 4294967295, %s5930_s20   ;;  %s4469_s22 = sadd.s32 4294967294, %s5930_s20   ;;  %s5930_s20 = sphi %s5972_s20, %s21_s20   ;;  %s5926_s19 = sphi %s5970_s19, %s7117_s19   ;;  %s5922_s18 = sphi %s5968_s18, %s7116_s18   ;;  %s5918_s17 = sphi %s5966_s17, %s7115_s17   ;;  %s5914_s16 = sphi %s5964_s16, %s7114_s16   ;;  %s5910_s15 = sphi %s5962_s15, %s7113_s15  }
   0x7   : > { %s33_s23 = sadd.s32 1, %s5926_s19  ;;  %s42_s24 = sadd.s32 1, %s5918_s17 }
   0x8   : > { %p35_p0 = scmp.ge.s32.totalorder %s33_s23, 2  ;;  %p49_p1 = scmp.ne.s32.totalorder %s5918_s17, %s5914_s16 }
   0x9   : > { %p50_p2 = scmp.eq.s32.totalorder %s5930_s20, 0  ;;  %p102_p3 = scmp.eq.s32.totalorder %s4468_s21, 1 }
   0xa   : > { %s7119_s23 = smov (%p35_p0, %s33_s23), 0  ;;  %p107_p6 = scmp.ne.s32.totalorder %s5914_s16, %s5910_s15 }
   0xb   : > { %p51_p4 = por %p50_p2, %p49_p1  ;;  %p6003_p5 = por %p102_p3, %p49_p1 }
   0xc   : > { %s37_s26 = ssub.s32 %s5926_s19, %s7119_s23  ;;  %p108_p8 = scmp.eq.s32.totalorder %s4469_s22, 1 }
   0xd   : > { %p40_p7 = scmp.eq.s32.totalorder %s37_s26, 0  ;;  %p4471_p10 = scmp.ge.s32.totalorder %s5930_s20, 2 }
   0xe   : > { %p6016_p9 = por %p108_p8, %p107_p6 }
   0xf   : > { %s6014_s27 = scalar_select %p40_p7, %s5918_s17, %s42_s24  }
  0x10   : > { %183 = sbr.rel (%p4471_p10) target bundleno = 59 (0x3b), region = 20 }
  0x17   : > { %186 = sbr.rel (!%p51_p4) target bundleno = 59 (0x3b), region = 24  ;;  %s188_s29 = sand.u32 (%p51_p4), 1, %s5918_s17  }
  0x18   : > { %s4826_s30 = sshll.u32 (%p51_p4), %s5926_s19, 5  ;;  %s4472_s5 = sshll.u32 (%p51_p4), %s188_s29, 9 }
  0x19   : > { %s6028_s8 = scalar_lea.vmem (%p51_p4), %s7106_s0, %s4826_s30  ;;  %s6033_s9 = scalar_lea.vmem (%p51_p4), [#allocation2], %s4472_s5 }
  0x1a   : > { %v211_v0 = vld [vmem:[%s6028_s8] sm:$0xff] (%p51_p4)   ;;  %v215_v1 = vld [vmem:[%s6028_s8 + $0x8] sm:$0xff] (%p51_p4)   ;;  %v219_v2 = vld [vmem:[%s6028_s8 + $0x10] sm:$0xff] (%p51_p4)  }
  0x1b   : > { %212 = vst [vmem:[%s6033_s9] sm:$0xff] (%p51_p4), %v211_v0   ;;  %216 = vst [vmem:[%s6033_s9 + $0x8] sm:$0xff] (%p51_p4), %v215_v1   ;;  %v223_v3 = vld [vmem:[%s6028_s8 + $0x18] sm:$0xff] (%p51_p4)   ;;  %v227_v4 = vld [vmem:[%s6028_s8 + $0x40] sm:$0xff] (%p51_p4)  }
  0x1c   : > { %220 = vst [vmem:[%s6033_s9 + $0x10] sm:$0xff] (%p51_p4), %v219_v2   ;;  %v231_v5 = vld [vmem:[%s6028_s8 + $0x48] sm:$0xff] (%p51_p4)   ;;  %224 = vst [vmem:[%s6033_s9 + $0x18] sm:$0xff] (%p51_p4), %v223_v3   ;;  %v235_v6 = vld [vmem:[%s6028_s8 + $0x50] sm:$0xff] (%p51_p4)  }
  0x1d   : > { %228 = vst [vmem:[%s6033_s9 + $0x20] sm:$0xff] (%p51_p4), %v227_v4   ;;  %232 = vst [vmem:[%s6033_s9 + $0x28] sm:$0xff] (%p51_p4), %v231_v5   ;;  %v239_v7 = vld [vmem:[%s6028_s8 + $0x58] sm:$0xff] (%p51_p4)   ;;  %v243_v8 = vld [vmem:[%s6028_s8 + $0x80] sm:$0xff] (%p51_p4)  }
  0x1e   : > { %236 = vst [vmem:[%s6033_s9 + $0x30] sm:$0xff] %v235_v6   ;;  %240 = vst [vmem:[%s6033_s9 + $0x38] sm:$0xff] %v239_v7   ;;  %v247_v9 = vld [vmem:[%s6028_s8 + $0x88] sm:$0xff]   ;;  %v251_v10 = vld [vmem:[%s6028_s8 + $0x90] sm:$0xff]  }
  0x1f   : > { %244 = vst [vmem:[%s6033_s9 + $0x40] sm:$0xff] %v243_v8   ;;  %v255_v11 = vld [vmem:[%s6028_s8 + $0x98] sm:$0xff]   ;;  %248 = vst [vmem:[%s6033_s9 + $0x48] sm:$0xff] %v247_v9   ;;  %v259_v12 = vld [vmem:[%s6028_s8 + $0xc0] sm:$0xff]  }
  0x20   : > { %252 = vst [vmem:[%s6033_s9 + $0x50] sm:$0xff] %v251_v10   ;;  %256 = vst [vmem:[%s6033_s9 + $0x58] sm:$0xff] %v255_v11   ;;  %v263_v13 = vld [vmem:[%s6028_s8 + $0xc8] sm:$0xff]   ;;  %v267_v14 = vld [vmem:[%s6028_s8 + $0xd0] sm:$0xff]  }
  0x21   : > { %260 = vst [vmem:[%s6033_s9 + $0x60] sm:$0xff] %v259_v12   ;;  %264 = vst [vmem:[%s6033_s9 + $0x68] sm:$0xff] %v263_v13   ;;  %v271_v15 = vld [vmem:[%s6028_s8 + $0xd8] sm:$0xff]   ;;  %v275_v16 = vld [vmem:[%s6028_s8 + $0x100] sm:$0xff]  }
  0x22   : > { %268 = vst [vmem:[%s6033_s9 + $0x70] sm:$0xff] %v267_v14   ;;  %v279_v17 = vld [vmem:[%s6028_s8 + $0x108] sm:$0xff]   ;;  %272 = vst [vmem:[%s6033_s9 + $0x78] sm:$0xff] %v271_v15   ;;  %v283_v18 = vld [vmem:[%s6028_s8 + $0x110] sm:$0xff]  }
  0x23   : > { %276 = vst [vmem:[%s6033_s9 + $0x80] sm:$0xff] %v275_v16   ;;  %280 = vst [vmem:[%s6033_s9 + $0x88] sm:$0xff] %v279_v17   ;;  %v287_v19 = vld [vmem:[%s6028_s8 + $0x118] sm:$0xff]   ;;  %v291_v20 = vld [vmem:[%s6028_s8 + $0x140] sm:$0xff]  }
  0x24   : > { %284 = vst [vmem:[%s6033_s9 + $0x90] sm:$0xff] %v283_v18   ;;  %288 = vst [vmem:[%s6033_s9 + $0x98] sm:$0xff] %v287_v19   ;;  %v295_v21 = vld [vmem:[%s6028_s8 + $0x148] sm:$0xff]   ;;  %v299_v22 = vld [vmem:[%s6028_s8 + $0x150] sm:$0xff]  }
  0x25   : > { %292 = vst [vmem:[%s6033_s9 + $0xa0] sm:$0xff] %v291_v20   ;;  %v303_v23 = vld [vmem:[%s6028_s8 + $0x158] sm:$0xff]   ;;  %296 = vst [vmem:[%s6033_s9 + $0xa8] sm:$0xff] %v295_v21   ;;  %v307_v24 = vld [vmem:[%s6028_s8 + $0x180] sm:$0xff]  }
  0x26   : > { %300 = vst [vmem:[%s6033_s9 + $0xb0] sm:$0xff] %v299_v22   ;;  %304 = vst [vmem:[%s6033_s9 + $0xb8] sm:$0xff] %v303_v23   ;;  %v311_v25 = vld [vmem:[%s6028_s8 + $0x188] sm:$0xff]   ;;  %v315_v26 = vld [vmem:[%s6028_s8 + $0x190] sm:$0xff]  }
  0x27   : > { %308 = vst [vmem:[%s6033_s9 + $0xc0] sm:$0xff] %v307_v24   ;;  %312 = vst [vmem:[%s6033_s9 + $0xc8] sm:$0xff] %v311_v25   ;;  %v319_v27 = vld [vmem:[%s6028_s8 + $0x198] sm:$0xff]   ;;  %v323_v28 = vld [vmem:[%s6028_s8 + $0x1c0] sm:$0xff]  }
  0x28   : > { %316 = vst [vmem:[%s6033_s9 + $0xd0] sm:$0xff] %v315_v26   ;;  %v327_v29 = vld [vmem:[%s6028_s8 + $0x1c8] sm:$0xff]   ;;  %320 = vst [vmem:[%s6033_s9 + $0xd8] sm:$0xff] %v319_v27   ;;  %v331_v30 = vld [vmem:[%s6028_s8 + $0x1d0] sm:$0xff]  }
  0x29   : > { %324 = vst [vmem:[%s6033_s9 + $0xe0] sm:$0xff] %v323_v28   ;;  %328 = vst [vmem:[%s6033_s9 + $0xe8] sm:$0xff] %v327_v29   ;;  %v335_v31 = vld [vmem:[%s6028_s8 + $0x1d8] sm:$0xff]   ;;  %v339_v32 = vld [vmem:[%s6028_s8 + $0x200] sm:$0xff]  }
  0x2a   : > { %332 = vst [vmem:[%s6033_s9 + $0xf0] sm:$0xff] %v331_v30   ;;  %336 = vst [vmem:[%s6033_s9 + $0xf8] sm:$0xff] %v335_v31   ;;  %v343_v33 = vld [vmem:[%s6028_s8 + $0x208] sm:$0xff]   ;;  %v347_v34 = vld [vmem:[%s6028_s8 + $0x210] sm:$0xff]  }
  0x2b   : > { %340 = vst [vmem:[%s6033_s9 + $0x100] sm:$0xff] %v339_v32   ;;  %v351_v35 = vld [vmem:[%s6028_s8 + $0x218] sm:$0xff]   ;;  %344 = vst [vmem:[%s6033_s9 + $0x108] sm:$0xff] %v343_v33   ;;  %v355_v36 = vld [vmem:[%s6028_s8 + $0x240] sm:$0xff]  }
  0x2c   : > { %348 = vst [vmem:[%s6033_s9 + $0x110] sm:$0xff] %v347_v34   ;;  %352 = vst [vmem:[%s6033_s9 + $0x118] sm:$0xff] %v351_v35   ;;  %v359_v37 = vld [vmem:[%s6028_s8 + $0x248] sm:$0xff]   ;;  %v363_v38 = vld [vmem:[%s6028_s8 + $0x250] sm:$0xff]  }
  0x2d   : > { %356 = vst [vmem:[%s6033_s9 + $0x120] sm:$0xff] %v355_v36   ;;  %360 = vst [vmem:[%s6033_s9 + $0x128] sm:$0xff] %v359_v37   ;;  %v367_v39 = vld [vmem:[%s6028_s8 + $0x258] sm:$0xff]   ;;  %v371_v40 = vld [vmem:[%s6028_s8 + $0x280] sm:$0xff]  }
  0x2e   : > { %364 = vst [vmem:[%s6033_s9 + $0x130] sm:$0xff] %v363_v38   ;;  %v375_v41 = vld [vmem:[%s6028_s8 + $0x288] sm:$0xff]   ;;  %368 = vst [vmem:[%s6033_s9 + $0x138] sm:$0xff] %v367_v39   ;;  %v379_v42 = vld [vmem:[%s6028_s8 + $0x290] sm:$0xff]  }
  0x2f   : > { %372 = vst [vmem:[%s6033_s9 + $0x140] sm:$0xff] %v371_v40   ;;  %376 = vst [vmem:[%s6033_s9 + $0x148] sm:$0xff] %v375_v41   ;;  %v383_v43 = vld [vmem:[%s6028_s8 + $0x298] sm:$0xff]   ;;  %v387_v44 = vld [vmem:[%s6028_s8 + $0x2c0] sm:$0xff]  }
  0x30   : > { %380 = vst [vmem:[%s6033_s9 + $0x150] sm:$0xff] %v379_v42   ;;  %384 = vst [vmem:[%s6033_s9 + $0x158] sm:$0xff] %v383_v43   ;;  %v391_v45 = vld [vmem:[%s6028_s8 + $0x2c8] sm:$0xff]   ;;  %v395_v46 = vld [vmem:[%s6028_s8 + $0x2d0] sm:$0xff]  }
  0x31   : > { %388 = vst [vmem:[%s6033_s9 + $0x160] sm:$0xff] %v387_v44   ;;  %v399_v47 = vld [vmem:[%s6028_s8 + $0x2d8] sm:$0xff]   ;;  %392 = vst [vmem:[%s6033_s9 + $0x168] sm:$0xff] %v391_v45   ;;  %v403_v48 = vld [vmem:[%s6028_s8 + $0x300] sm:$0xff]  }
  0x32   : > { %396 = vst [vmem:[%s6033_s9 + $0x170] sm:$0xff] %v395_v46   ;;  %400 = vst [vmem:[%s6033_s9 + $0x178] sm:$0xff] %v399_v47   ;;  %v407_v49 = vld [vmem:[%s6028_s8 + $0x308] sm:$0xff]   ;;  %v411_v50 = vld [vmem:[%s6028_s8 + $0x310] sm:$0xff]  }
  0x33   : > { %404 = vst [vmem:[%s6033_s9 + $0x180] sm:$0xff] %v403_v48   ;;  %408 = vst [vmem:[%s6033_s9 + $0x188] sm:$0xff] %v407_v49   ;;  %v415_v51 = vld [vmem:[%s6028_s8 + $0x318] sm:$0xff]   ;;  %v419_v52 = vld [vmem:[%s6028_s8 + $0x340] sm:$0xff]  }
  0x34   : > { %412 = vst [vmem:[%s6033_s9 + $0x190] sm:$0xff] %v411_v50   ;;  %v423_v53 = vld [vmem:[%s6028_s8 + $0x348] sm:$0xff]   ;;  %416 = vst [vmem:[%s6033_s9 + $0x198] sm:$0xff] %v415_v51   ;;  %v427_v54 = vld [vmem:[%s6028_s8 + $0x350] sm:$0xff]  }
  0x35   : > { %420 = vst [vmem:[%s6033_s9 + $0x1a0] sm:$0xff] %v419_v52   ;;  %424 = vst [vmem:[%s6033_s9 + $0x1a8] sm:$0xff] %v423_v53   ;;  %v431_v55 = vld [vmem:[%s6028_s8 + $0x358] sm:$0xff]   ;;  %v435_v56 = vld [vmem:[%s6028_s8 + $0x380] sm:$0xff]  }
  0x36   : > { %428 = vst [vmem:[%s6033_s9 + $0x1b0] sm:$0xff] %v427_v54   ;;  %432 = vst [vmem:[%s6033_s9 + $0x1b8] sm:$0xff] %v431_v55   ;;  %v439_v57 = vld [vmem:[%s6028_s8 + $0x388] sm:$0xff]   ;;  %v443_v58 = vld [vmem:[%s6028_s8 + $0x390] sm:$0xff]  }
  0x37   : > { %436 = vst [vmem:[%s6033_s9 + $0x1c0] sm:$0xff] %v435_v56   ;;  %v447_v59 = vld [vmem:[%s6028_s8 + $0x398] sm:$0xff]   ;;  %440 = vst [vmem:[%s6033_s9 + $0x1c8] sm:$0xff] %v439_v57   ;;  %v451_v60 = vld [vmem:[%s6028_s8 + $0x3c0] sm:$0xff]  }
  0x38   : > { %444 = vst [vmem:[%s6033_s9 + $0x1d0] sm:$0xff] %v443_v58   ;;  %448 = vst [vmem:[%s6033_s9 + $0x1d8] sm:$0xff] %v447_v59   ;;  %v455_v61 = vld [vmem:[%s6028_s8 + $0x3c8] sm:$0xff]   ;;  %v459_v62 = vld [vmem:[%s6028_s8 + $0x3d0] sm:$0xff]  }
  0x39   : > { %452 = vst [vmem:[%s6033_s9 + $0x1e0] sm:$0xff] %v451_v60   ;;  %456 = vst [vmem:[%s6033_s9 + $0x1e8] sm:$0xff] %v455_v61   ;;  %v463_v63 = vld [vmem:[%s6028_s8 + $0x3d8] sm:$0xff]  }
  0x3a   : > { %460 = vst [vmem:[%s6033_s9 + $0x1f0] sm:$0xff] %v459_v62   ;;  %464 = vst [vmem:[%s6033_s9 + $0x1f8] sm:$0xff] %v463_v63  }
  0x3b PF: > { %p4475_p11 = scmp.ge.s32.totalorder %s5930_s20, 1  ;;  %p744_p12 = scmp.lt.s32.totalorder %s5930_s20, 3 }
  0x3d   : > { %p745_p13 = pnand %p4475_p11, %p744_p12 }
  0x3e   : > { %v6165_v0 = vld [vmem:[%s7107_s1 + $0x2] sm:$0x3] (!%p745_p13)  ;;  %vm983_vm0 = vcmask (!%p745_p13), 1041408   ;;  %s6168_s12 = sand.u32 (!%p745_p13), 1, %s5914_s16   ;;  %v6182_v2 = vld [vmem:[%s7107_s1] sm:$0x3] (!%p745_p13) }
  0x3f   : > { %748 = sbr.rel (%p745_p13) target bundleno = 640 (0x280), region = 65  ;;  %5625 = vmatprep.subr.msk.bf16.mxu0 (!%p745_p13), %vm983_vm0, %v6165_v0  ;;  %v6174_v1 = vsel (!%p745_p13), %vm983_vm0, %v6165_v0, 0  ;;  %5634 = vmatprep.subr.msk.bf16.mxu1 (!%p745_p13), %vm983_vm0, %v6165_v0  ;;  %s4476_s13 = sshll.u32 (!%p745_p13), %s6168_s12, 9  ;;  %vm970_vm1 = vcmask (!%p745_p13), 31744   ;;  %v6198_v6 = vsel (!%p745_p13), %vm983_vm0, %v6182_v2, 0 }
  0x40   : > { %5010 = vmatpush3.bf16.msra.mxu0 (!%p745_p13), %v6174_v1  ;;  %5100 = vmatpush3.bf16.msra.mxu1 (!%p745_p13), %v6174_v1  ;;  %s6186_s26 = scalar_lea.vmem (!%p745_p13), [#allocation2], %s4476_s13  ;;  %v6203_v7 = vld [vmem:[%s7107_s1 + $0x4] sm:$0x3] (!%p745_p13)  ;;  %v6236_v17 = vld [vmem:[%s7107_s1 + $0x6] sm:$0x3] (!%p745_p13)  ;;  %s6900_s7 = sand.u32 (!%p745_p13), 1, %s4468_s21  }
  0x41   : > { %v5728_v3 = vld [vmem:[%s6186_s26 + $0x20] sm:$0xff] (!%p745_p13)   ;;  %5626 = vmatprep.subr.msk.bf16.mxu0 (!%p745_p13), %vm983_vm0, %v6182_v2  ;;  %5635 = vmatprep.subr.msk.bf16.mxu1 (!%p745_p13), %vm983_vm0, %v6182_v2  ;;  %v5730_v5 = vld [vmem:[%s6186_s26 + $0x28] sm:$0xff] (!%p745_p13)   ;;  %v5732_v9 = vld [vmem:[%s6186_s26 + $0x30] sm:$0xff] (!%p745_p13)   ;;  %v6229_v15 = vsel (!%p745_p13), %vm983_vm0, %v6203_v7, 0  ;;  %v6256_v21 = vsel (!%p745_p13), %vm983_vm0, %v6236_v17, 0  ;;  %s4827_s21 = sshll.u32 (!%p745_p13), %s5922_s18, 10 }
  0x42   : > { %v5729_v4 = vld [vmem:[%s6186_s26 + $0x40] sm:$0xff] (!%p745_p13)   ;;  %5011 = vmatprep.mubr.msk.bf16.mxu0 (!%p745_p13), %vm970_vm1, %v5728_v3  ;;  %v5731_v8 = vld [vmem:[%s6186_s26 + $0x48] sm:$0xff] (!%p745_p13)   ;;  %v5733_v10 = vld [vmem:[%s6186_s26 + $0x50] sm:$0xff] (!%p745_p13)   ;;  %s6951_s13 = scalar_lea.hbm (!%p745_p13), %s7108_s2, %s4827_s21  ;;  %s6966_s29 = scalar_lea.hbm (!%p745_p13), %s7109_s3, %s4827_s21 }
  0x43   : > { %5101 = vmatprep.mubr.msk.bf16.mxu1 (!%p745_p13), %vm970_vm1, %v5729_v4  ;;  %5012 = vmatmul.mubr.msk.bf16.vlgmr.msra.gmra.mrb[0].mxu0 (!%p745_p13), %vm970_vm1, %v5730_v5  ;;  %v5734_v11 = vld [vmem:[%s6186_s26 + $0x38] sm:$0xff] (!%p745_p13)   ;;  %v5736_v13 = vld [vmem:[%s6186_s26] sm:$0xff] (!%p745_p13)   ;;  %v5737_v14 = vld [vmem:[%s6186_s26 + $0x8] sm:$0xff] (!%p745_p13)   ;;  %s4264_s30 = scalar_lea.sflag (!%p745_p13), [#allocation4], %s6168_s12  ;;  %s5932_s21 = smov (!%p745_p13), [#allocation3]  }
  0x44   : > { %5020 = vmatpush3.bf16.msra.mxu0 (!%p745_p13), %v6198_v6  ;;  %5102 = vmatmul.mubr.msk.bf16.vlgmr.msra.gmra.mrb[0].mxu1 (!%p745_p13), %vm970_vm1, %v5731_v8  ;;  %v5735_v12 = vld [vmem:[%s6186_s26 + $0x58] sm:$0xff] (!%p745_p13)   ;;  %v5738_v16 = vld [vmem:[%s6186_s26 + $0x10] sm:$0xff] (!%p745_p13)   ;;  %v5740_v19 = vld [vmem:[%s6186_s26 + $0x60] sm:$0xff] (!%p745_p13)   ;;  %s5796_s10 = sshll.u32 (!%p745_p13), %s5932_s21, 4  ;;  %s5797_s10 = int_to_ptr.vmem [resolvable:$false] %s5796_s10 }
  0x45   : > { %5110 = vmatpush3.bf16.msra.mxu1 (!%p745_p13), %v6198_v6  ;;  %5015 = vmatprep.mubr.msk.bf16.mxu0 (!%p745_p13), %vm970_vm1, %v5732_v9  ;;  %v5739_v18 = vld [vmem:[%s6186_s26 + $0x18] sm:$0xff] (!%p745_p13)   ;;  %v5741_v20 = vld [vmem:[%s6186_s26 + $0x68] sm:$0xff] (!%p745_p13)   ;;  %v5742_v22 = vld [vmem:[%s6186_s26 + $0x70] sm:$0xff] (!%p745_p13)   ;;  %s5798_s11 = scalar_lea.vmem (!%p745_p13), %s5797_s10, 2048 }
  0x46   : > { %5105 = vmatprep.mubr.msk.bf16.mxu1 %vm970_vm1, %v5733_v10  ;;  %5627 = vmatprep.subr.msk.bf16.mxu0 %vm983_vm0, %v6203_v7  ;;  %v6263_v23 = vld [vmem:[%s7107_s1 + $0x8] sm:$0x3]  ;;  %v5743_v24 = vld [vmem:[%s6186_s26 + $0x78] sm:$0xff]   ;;  %v6276_v25 = vld [vmem:[%s6186_s26 + $0x80] sm:$0xff]  }
  0x47   : > { %5636 = vmatprep.subr.msk.bf16.mxu1 %vm983_vm0, %v6203_v7  ;;  %v6279_v26 = vld [vmem:[%s6186_s26 + $0xa0] sm:$0xff]   ;;  %v6288_v27 = vld [vmem:[%s6186_s26 + $0x88] sm:$0xff]   ;;  %v6294_v29 = vld [vmem:[%s6186_s26 + $0x90] sm:$0xff]   ;;  %v6298_v30 = vsel %vm983_vm0, %v6263_v23, 0 }
  0x48   : > { %v6291_v28 = vld [vmem:[%s6186_s26 + $0xa8] sm:$0xff]   ;;  %v6301_v31 = vld [vmem:[%s6186_s26 + $0xb0] sm:$0xff]   ;;  %v6317_v33 = vld [vmem:[%s6186_s26 + $0x98] sm:$0xff]  }
  0x49   : > { %v6306_v32 = vld [vmem:[%s7107_s1 + $0xa] sm:$0x3]  ;;  %v6322_v34 = vld [vmem:[%s6186_s26 + $0xb8] sm:$0xff]   ;;  %v6327_v35 = vld [vmem:[%s6186_s26 + $0xc0] sm:$0xff]  }
  0x4a   : > { %v6340_v36 = vld [vmem:[%s6186_s26 + $0xc8] sm:$0xff]   ;;  %v6344_v37 = vsel %vm983_vm0, %v6306_v32, 0  ;;  %v6347_v38 = vld [vmem:[%s6186_s26 + $0xd0] sm:$0xff]   ;;  %v6369_v40 = vld [vmem:[%s6186_s26 + $0xd8] sm:$0xff]  }
  0x4b   : > { %5016 = vmatmul.mubr.msk.bf16.gmra.mrb[4].mxu0 %vm970_vm1, %v5734_v11  ;;  %v6354_v39 = vld [vmem:[%s7107_s1 + $0xc] sm:$0x3]  ;;  %v6372_v41 = vld [vmem:[%s6186_s26 + $0xe0] sm:$0xff]   ;;  %v6390_v44 = vld [vmem:[%s6186_s26 + $0xf0] sm:$0xff]  }
  0x4c   : > { %5106 = vmatmul.mubr.msk.bf16.gmra.mrb[4].mxu1 %vm970_vm1, %v5735_v12  ;;  %5021 = vmatprep.mubr.msk.bf16.mxu0 %vm970_vm1, %v5736_v13  ;;  %v6383_v42 = vld [vmem:[%s6186_s26 + $0xe8] sm:$0xff]   ;;  %v6387_v43 = vsel %vm983_vm0, %v6354_v39, 0  ;;  %v6412_v46 = vld [vmem:[%s6186_s26 + $0xf8] sm:$0xff]   ;;  %v6415_v47 = vld [vmem:[%s6186_s26 + $0x100] sm:$0xff]  }
  0x4d   : > { %5111 = vmatprep.mubr.msk.bf16.mxu1 %vm970_vm1, %v5728_v3  ;;  %v6397_v45 = vld [vmem:[%s7107_s1 + $0xe] sm:$0x3]  ;;  %v6418_v48 = vld [vmem:[%s6186_s26 + $0x120] sm:$0xff]   ;;  %v6439_v52 = vld [vmem:[%s6186_s26 + $0x110] sm:$0xff]  }
  0x4e   : > { %v6429_v49 = vld [vmem:[%s6186_s26 + $0x108] sm:$0xff]   ;;  %v6436_v51 = vsel %vm983_vm0, %v6397_v45, 0  ;;  %v6442_v53 = vld [vmem:[%s6186_s26 + $0x130] sm:$0xff]   ;;  %v6462_v55 = vld [vmem:[%s6186_s26 + $0x118] sm:$0xff]  }
  0x4f   : > { %v6432_v50 = vld [vmem:[%s6186_s26 + $0x128] sm:$0xff]   ;;  %v6449_v54 = vld [vmem:[%s7107_s1 + $0x10] sm:$0x3]  ;;  %v6467_v56 = vld [vmem:[%s6186_s26 + $0x138] sm:$0xff]  }
  0x50   : > { %v6470_v57 = vld [vmem:[%s6186_s26 + $0x140] sm:$0xff]   ;;  %v6481_v58 = vld [vmem:[%s6186_s26 + $0x148] sm:$0xff]   ;;  %v6485_v59 = vsel %vm983_vm0, %v6449_v54, 0  ;;  %v6488_v60 = vld [vmem:[%s6186_s26 + $0x150] sm:$0xff]  }
  0x51   : > { %v6505_v61 = vld [vmem:[%s6186_s26 + $0x158] sm:$0xff]   ;;  %v6508_v62 = vld [vmem:[%s6186_s26 + $0x160] sm:$0xff]   ;;  %v6519_v63 = vld [vmem:[%s6186_s26 + $0x168] sm:$0xff]  }
  0x52   : > { %v6539_v3 = vld [vmem:[%s6186_s26 + $0x178] sm:$0xff]  }
  0x53   : > { %5022 = vmatmul.mubr.msk.bf16.vlgmr.msra.gmra.mrb[0].mxu0 %vm970_vm1, %v5737_v14  ;;  %v5787_v13 = vld [vmem:[%s6186_s26 + $0x1d8] sm:$0xff]   ;;  %v5788_v14 = vld [vmem:[%s6186_s26 + $0x1e0] sm:$0xff]  }
  0x54   : > { %5030 = vmatpush3.bf16.msra.mxu0 %v6229_v15  ;;  %5112 = vmatmul.mubr.msk.bf16.vlgmr.msra.gmra.mrb[0].mxu1 %vm970_vm1, %v5730_v5  ;;  %v5779_v5 = vld [vmem:[%s6186_s26 + $0x1a8] sm:$0xff]  }
  0x55   : > { %5120 = vmatpush3.bf16.msra.mxu1 %v6229_v15  ;;  %5025 = vmatprep.mubr.msk.bf16.mxu0 %vm970_vm1, %v5738_v16  ;;  %v5790_v16 = vld [vmem:[%s6186_s26 + $0x1f0] sm:$0xff]  }
  0x56   : > { %5115 = vmatprep.mubr.msk.bf16.mxu1 %vm970_vm1, %v5732_v9  ;;  %5628 = vmatprep.subr.msk.bf16.mxu0 %vm983_vm0, %v6236_v17  ;;  %v5783_v9 = vld [vmem:[%s6186_s26 + $0x1b8] sm:$0xff]  }
  0x57   : > { %5637 = vmatprep.subr.msk.bf16.mxu1 %vm983_vm0, %v6236_v17 }
  0x5b   : > { %5026 = vmatmul.mubr.msk.bf16.gmra.mrb[4].mxu0 %vm970_vm1, %v5739_v18 }
  0x5c   : > { %5116 = vmatmul.mubr.msk.bf16.gmra.mrb[4].mxu1 %vm970_vm1, %v5734_v11  ;;  %5031 = vmatprep.mubr.msk.bf16.mxu0 %vm970_vm1, %v5729_v4  ;;  %v5778_v4 = vld [vmem:[%s6186_s26 + $0x188] sm:$0xff]  }
  0x5d   : > { %5121 = vmatprep.mubr.msk.bf16.mxu1 %vm970_vm1, %v5740_v19  ;;  %v5785_v11 = vld [vmem:[%s6186_s26 + $0x1c8] sm:$0xff]  }
  0x63   : > { %5032 = vmatmul.mubr.msk.bf16.vlgmr.msra.gmra.mrb[0].mxu0 %vm970_vm1, %v5731_v8  ;;  %v5782_v8 = vld [vmem:[%s6186_s26 + $0x198] sm:$0xff]  }
  0x64   : > { %5040 = vmatpush3.bf16.msra.mxu0 %v6256_v21  ;;  %5122 = vmatmul.mubr.msk.bf16.vlgmr.msra.gmra.mrb[0].mxu1 %vm970_vm1, %v5741_v20 }
  0x65   : > { %5130 = vmatpush3.bf16.msra.mxu1 %v6256_v21  ;;  %5035 = vmatprep.mubr.msk.bf16.mxu0 %vm970_vm1, %v5733_v10  ;;  %v5784_v10 = vld [vmem:[%s6186_s26 + $0x1c0] sm:$0xff]  }
  0x66   : > { %5125 = vmatprep.mubr.msk.bf16.mxu1 %vm970_vm1, %v5742_v22  ;;  %5629 = vmatprep.subr.msk.bf16.mxu0 %vm983_vm0, %v6263_v23 }
  0x67   : > { %5638 = vmatprep.subr.msk.bf16.mxu1 %vm983_vm0, %v6263_v23 }
  0x6b   : > { %5036 = vmatmul.mubr.msk.bf16.gmra.mrb[4].mxu0 %vm970_vm1, %v5735_v12  ;;  %v5786_v12 = vld [vmem:[%s6186_s26 + $0x1d0] sm:$0xff]  }
  0x6c   : > { %5126 = vmatmul.mubr.msk.bf16.gmra.mrb[4].mxu1 %vm970_vm1, %v5743_v24  ;;  %5041 = vmatprep.mubr.msk.bf16.mxu0 %vm970_vm1, %v6276_v25 }
  0x6d   : > { %5131 = vmatprep.mubr.msk.bf16.mxu1 %vm970_vm1, %v6279_v26 }
  0x73   : > { %5042 = vmatmul.mubr.msk.bf16.vlgmr.msra.gmra.mrb[0].mxu0 %vm970_vm1, %v6288_v27 }
  0x74   : > { %5050 = vmatpush3.bf16.msra.mxu0 %v6298_v30  ;;  %5132 = vmatmul.mubr.msk.bf16.vlgmr.msra.gmra.mrb[0].mxu1 %vm970_vm1, %v6291_v28 }
  0x75   : > { %5140 = vmatpush3.bf16.msra.mxu1 %v6298_v30  ;;  %5045 = vmatprep.mubr.msk.bf16.mxu0 %vm970_vm1, %v6294_v29 }
  0x76   : > { %5135 = vmatprep.mubr.msk.bf16.mxu1 %vm970_vm1, %v6301_v31  ;;  %5630 = vmatprep.subr.msk.bf16.mxu0 %vm983_vm0, %v6306_v32 }
  0x77   : > { %5639 = vmatprep.subr.msk.bf16.mxu1 %vm983_vm0, %v6306_v32 }
  0x7b   : > { %5046 = vmatmul.mubr.msk.bf16.gmra.mrb[4].mxu0 %vm970_vm1, %v6317_v33 }
  0x7c   : > { %5136 = vmatmul.mubr.msk.bf16.gmra.mrb[4].mxu1 %vm970_vm1, %v6322_v34  ;;  %5051 = vmatprep.mubr.msk.bf16.mxu0 %vm970_vm1, %v6279_v26 }
  0x7d   : > { %5141 = vmatprep.mubr.msk.bf16.mxu1 %vm970_vm1, %v6327_v35 }
  0x83   : > { %5052 = vmatmul.mubr.msk.bf16.vlgmr.msra.gmra.mrb[0].mxu0 %vm970_vm1, %v6291_v28 }
  0x84   : > { %5060 = vmatpush3.bf16.msra.mxu0 %v6344_v37  ;;  %5142 = vmatmul.mubr.msk.bf16.vlgmr.msra.gmra.mrb[0].mxu1 %vm970_vm1, %v6340_v36 }
  0x85   : > { %5150 = vmatpush3.bf16.msra.mxu1 %v6344_v37  ;;  %5055 = vmatprep.mubr.msk.bf16.mxu0 %vm970_vm1, %v6301_v31 }
  0x86   : > { %5145 = vmatprep.mubr.msk.bf16.mxu1 %vm970_vm1, %v6347_v38  ;;  %5631 = vmatprep.subr.msk.bf16.mxu0 %vm983_vm0, %v6354_v39 }
  0x87   : > { %5640 = vmatprep.subr.msk.bf16.mxu1 %vm983_vm0, %v6354_v39 }
  0x8b   : > { %5056 = vmatmul.mubr.msk.bf16.gmra.mrb[4].mxu0 %vm970_vm1, %v6322_v34 }
  0x8c   : > { %5146 = vmatmul.mubr.msk.bf16.gmra.mrb[4].mxu1 %vm970_vm1, %v6369_v40  ;;  %5061 = vmatprep.mubr.msk.bf16.mxu0 %vm970_vm1, %v6327_v35 }
  0x8d   : > { %5151 = vmatprep.mubr.msk.bf16.mxu1 %vm970_vm1, %v6372_v41 }
  0x93   : > { %5062 = vmatmul.mubr.msk.bf16.vlgmr.msra.gmra.mrb[0].mxu0 %vm970_vm1, %v6340_v36 }
  0x94   : > { %5070 = vmatpush3.bf16.msra.mxu0 %v6387_v43  ;;  %5152 = vmatmul.mubr.msk.bf16.vlgmr.msra.gmra.mrb[0].mxu1 %vm970_vm1, %v6383_v42 }
  0x95   : > { %5160 = vmatpush3.bf16.msra.mxu1 %v6387_v43  ;;  %5065 = vmatprep.mubr.msk.bf16.mxu0 %vm970_vm1, %v6347_v38 }
  0x96   : > { %5155 = vmatprep.mubr.msk.bf16.mxu1 %vm970_vm1, %v6390_v44  ;;  %5632 = vmatprep.subr.msk.bf16.mxu0 %vm983_vm0, %v6397_v45 }
  0x97   : > { %5641 = vmatprep.subr.msk.bf16.mxu1 %vm983_vm0, %v6397_v45 }
  0x9b   : > { %5066 = vmatmul.mubr.msk.bf16.gmra.mrb[4].mxu0 %vm970_vm1, %v6369_v40 }
  0x9c   : > { %5156 = vmatmul.mubr.msk.bf16.gmra.mrb[4].mxu1 %vm970_vm1, %v6412_v46  ;;  %5071 = vmatprep.mubr.msk.bf16.mxu0 %vm970_vm1, %v6415_v47 }
  0x9d   : > { %5161 = vmatprep.mubr.msk.bf16.mxu1 %vm970_vm1, %v6418_v48 }
  0xa3   : > { %5072 = vmatmul.mubr.msk.bf16.vlgmr.msra.gmra.mrb[0].mxu0 %vm970_vm1, %v6429_v49 }
  0xa4   : > { %5080 = vmatpush3.bf16.msra.mxu0 %v6436_v51  ;;  %5162 = vmatmul.mubr.msk.bf16.vlgmr.msra.gmra.mrb[0].mxu1 %vm970_vm1, %v6432_v50 }
  0xa5   : > { %5170 = vmatpush3.bf16.msra.mxu1 %v6436_v51  ;;  %5075 = vmatprep.mubr.msk.bf16.mxu0 %vm970_vm1, %v6439_v52 }
  0xa6   : > { %5165 = vmatprep.mubr.msk.bf16.mxu1 %vm970_vm1, %v6442_v53  ;;  %5633 = vmatprep.subr.msk.bf16.mxu0 %vm983_vm0, %v6449_v54 }
  0xa7   : > { %5642 = vmatprep.subr.msk.bf16.mxu1 %vm983_vm0, %v6449_v54 }
  0xab   : > { %5076 = vmatmul.mubr.msk.bf16.gmra.mrb[4].mxu0 %vm970_vm1, %v6462_v55 }
  0xac   : > { %5166 = vmatmul.mubr.msk.bf16.gmra.mrb[4].mxu1 %vm970_vm1, %v6467_v56  ;;  %5081 = vmatprep.mubr.msk.bf16.mxu0 %vm970_vm1, %v6418_v48 }
  0xad   : > { %5171 = vmatprep.mubr.msk.bf16.mxu1 %vm970_vm1, %v6470_v57 }
  0xb3   : > { %5082 = vmatmul.mubr.msk.bf16.vlgmr.msra.gmra.mrb[0].mxu0 %vm970_vm1, %v6432_v50 }
  0xb4   : > { %5090 = vmatpush3.bf16.msra.mxu0 %v6485_v59  ;;  %5172 = vmatmul.mubr.msk.bf16.vlgmr.msra.gmra.mrb[0].mxu1 %vm970_vm1, %v6481_v58 }
  0xb5   : > { %5180 = vmatpush3.bf16.msra.mxu1 %v6485_v59  ;;  %5085 = vmatprep.mubr.msk.bf16.mxu0 %vm970_vm1, %v6442_v53 }
  0xb6   : > { %5175 = vmatprep.mubr.msk.bf16.mxu1 %vm970_vm1, %v6488_v60  ;;  %5643 = vmatprep.subr.msk.bf16.mxu0 %vm983_vm0, %v6165_v0 }
  0xb7   : > { %5652 = vmatprep.subr.msk.bf16.mxu1 %vm983_vm0, %v6165_v0  ;;  %v6522_v0 = vld [vmem:[%s6186_s26 + $0x170] sm:$0xff]  }
  0xbb   : > { %5086 = vmatmul.mubr.msk.bf16.gmra.mrb[4].mxu0 %vm970_vm1, %v6467_v56 }
  0xbc   : > { %5176 = vmatmul.mubr.msk.bf16.gmra.mrb[4].mxu1 %vm970_vm1, %v6505_v61  ;;  %5091 = vmatprep.mubr.msk.bf16.mxu0 %vm970_vm1, %v6470_v57 }
  0xbd   : > { %5181 = vmatprep.mubr.msk.bf16.mxu1 %vm970_vm1, %v6508_v62 }
  0xc3   : > { %5092 = vmatmul.mubr.msk.bf16.vlgmr.msra.gmra.mrb[0].mxu0 %vm970_vm1, %v6481_v58 }
  0xc4   : > { %5182 = vmatmul.mubr.msk.bf16.vlgmr.msra.gmra.mrb[0].mxu1 %vm970_vm1, %v6519_v63  ;;  %5190 = vmatpush3.bf16.msra.mxu0 %v6174_v1 }
  0xc5   : > { %5280 = vmatpush3.bf16.msra.mxu1 %v6174_v1  ;;  %5095 = vmatprep.mubr.msk.bf16.mxu0 %vm970_vm1, %v6488_v60  ;;  %v5776_v1 = vld [vmem:[%s6186_s26 + $0x180] sm:$0xff]  }
  0xc6   : > { %5185 = vmatprep.mubr.msk.bf16.mxu1 %vm970_vm1, %v6522_v0  ;;  %5644 = vmatprep.subr.msk.bf16.mxu0 %vm983_vm0, %v6182_v2 }
  0xc7   : > { %5653 = vmatprep.subr.msk.bf16.mxu1 %vm983_vm0, %v6182_v2  ;;  %v5777_v2 = vld [vmem:[%s6186_s26 + $0x1a0] sm:$0xff]  }
  0xcb   : > { %5096 = vmatmul.mubr.msk.bf16.gmra.mrb[4].mxu0 %vm970_vm1, %v6505_v61 }
  0xcc   : > { %5186 = vmatmul.mubr.msk.bf16.gmra.mrb[4].mxu1 %vm970_vm1, %v6539_v3  ;;  %5191 = vmatprep.mubr.msk.bf16.mxu0 %vm970_vm1, %v6279_v26 }
  0xcd   : > { %5281 = vmatprep.mubr.msk.bf16.mxu1 %vm970_vm1, %v6327_v35 }
  0xd3   : > { %5192 = vmatmul.mubr.msk.bf16.vlgmr.msra.gmra.mrb[8].mxu0 %vm970_vm1, %v6291_v28 }
  0xd4   : > { %5200 = vmatpush3.bf16.msra.mxu0 %v6198_v6  ;;  %5282 = vmatmul.mubr.msk.bf16.vlgmr.msra.gmra.mrb[8].mxu1 %vm970_vm1, %v6340_v36 }
  0xd5   : > { %5290 = vmatpush3.bf16.msra.mxu1 %v6198_v6  ;;  %5195 = vmatprep.mubr.msk.bf16.mxu0 %vm970_vm1, %v6301_v31  ;;  %v5780_v6 = vld [vmem:[%s6186_s26 + $0x190] sm:$0xff]  }
  0xd6   : > { %5285 = vmatprep.mubr.msk.bf16.mxu1 %vm970_vm1, %v6347_v38  ;;  %5645 = vmatprep.subr.msk.bf16.mxu0 %vm983_vm0, %v6203_v7 }
  0xd7   : > { %5654 = vmatprep.subr.msk.bf16.mxu1 %vm983_vm0, %v6203_v7  ;;  %v5781_v7 = vld [vmem:[%s6186_s26 + $0x1b0] sm:$0xff]  }
  0xdb   : > { %5196 = vmatmul.mubr.msk.bf16.gmra.mrb[12].mxu0 %vm970_vm1, %v6322_v34 }
  0xdc   : > { %5286 = vmatmul.mubr.msk.bf16.gmra.mrb[12].mxu1 %vm970_vm1, %v6369_v40  ;;  %5201 = vmatprep.mubr.msk.bf16.mxu0 %vm970_vm1, %v6276_v25 }
  0xdd   : > { %5291 = vmatprep.mubr.msk.bf16.mxu1 %vm970_vm1, %v6279_v26 }
  0xe3   : > { %5202 = vmatmul.mubr.msk.bf16.vlgmr.msra.gmra.mrb[8].mxu0 %vm970_vm1, %v6288_v27 }
  0xe4   : > { %5210 = vmatpush3.bf16.msra.mxu0 %v6229_v15  ;;  %5292 = vmatmul.mubr.msk.bf16.vlgmr.msra.gmra.mrb[8].mxu1 %vm970_vm1, %v6291_v28 }
  0xe5   : > { %5300 = vmatpush3.bf16.msra.mxu1 %v6229_v15  ;;  %5205 = vmatprep.mubr.msk.bf16.mxu0 %vm970_vm1, %v6294_v29  ;;  %v5789_v15 = vld [vmem:[%s6186_s26 + $0x1e8] sm:$0xff]  }
  0xe6   : > { %5295 = vmatprep.mubr.msk.bf16.mxu1 %vm970_vm1, %v6301_v31  ;;  %5646 = vmatprep.subr.msk.bf16.mxu0 %vm983_vm0, %v6236_v17 }
  0xe7   : > { %5655 = vmatprep.subr.msk.bf16.mxu1 %vm983_vm0, %v6236_v17  ;;  %v5791_v17 = vld [vmem:[%s6186_s26 + $0x1f8] sm:$0xff]   ;;  %s4477_s26 = sshll.u32 %s6168_s12, 6 }
  0xe8   : > { %s6866_s5 = scalar_lea.vmem [#allocation3], %s4477_s26  ;;  %s6869_s6 = scalar_lea.vmem [#allocation5], %s4477_s26 }
  0xe9   : > { %s4289_s8 = sshll.u32 %s6866_s5, 4  ;;  %s4307_s9 = sshll.u32 %s6869_s6, 4  ;;  %s6953_s8 = int_to_ptr.vmem [resolvable:$true] %s4289_s8  ;;  %s6968_s9 = int_to_ptr.vmem [resolvable:$true] %s4307_s9 }
  0xea   : > { %s5792_s26 = scalar_lea.vmem %s6953_s8, 1024  ;;  %p5799_p3 = scmp.lt.s32.totalorder %s6953_s8, %s5797_s10 }
  0xeb   : > { %5206 = vmatmul.mubr.msk.bf16.gmra.mrb[12].mxu0 %vm970_vm1, %v6317_v33  ;;  %p5793_p0 = scmp.ne.s32.totalorder %s6953_s8, %s5792_s26  ;;  %p5800_p4 = scmp.lt.s32.totalorder %s5798_s11, %s5792_s26 }
  0xec   : > { %5296 = vmatmul.mubr.msk.bf16.gmra.mrb[12].mxu1 %vm970_vm1, %v6322_v34  ;;  %5211 = vmatprep.mubr.msk.bf16.mxu0 %vm970_vm1, %v6327_v35 }
  0xed   : > { %5301 = vmatprep.mubr.msk.bf16.mxu1 %vm970_vm1, %v6372_v41  ;;  %p5794_p1 = pnand %p5793_p0, %p6003_p5  ;;  %p5801_p6 = por %p5800_p4, %p5799_p3 }
  0xef   : > { %p5795_p2 = pneg %p5794_p1 }
  0xf1   : > { %p5802_p7 = pnand %p5801_p6, %p5795_p2 }
  0xf3   : > { %5212 = vmatmul.mubr.msk.bf16.vlgmr.msra.gmra.mrb[8].mxu0 %vm970_vm1, %v6340_v36 }
  0xf4   : > { %5220 = vmatpush3.bf16.msra.mxu0 %v6256_v21  ;;  %5302 = vmatmul.mubr.msk.bf16.vlgmr.msra.gmra.mrb[8].mxu1 %vm970_vm1, %v6383_v42 }
  0xf5   : > { %5310 = vmatpush3.bf16.msra.mxu1 %v6256_v21  ;;  %5215 = vmatprep.mubr.msk.bf16.mxu0 %vm970_vm1, %v6347_v38 }
  0xf6   : > { %5305 = vmatprep.mubr.msk.bf16.mxu1 %vm970_vm1, %v6390_v44  ;;  %5647 = vmatprep.subr.msk.bf16.mxu0 %vm983_vm0, %v6263_v23 }
  0xf7   : > { %5656 = vmatprep.subr.msk.bf16.mxu1 %vm983_vm0, %v6263_v23 }
  0xfb   : > { %5216 = vmatmul.mubr.msk.bf16.gmra.mrb[12].mxu0 %vm970_vm1, %v6369_v40 }
  0xfc   : > { %5306 = vmatmul.mubr.msk.bf16.gmra.mrb[12].mxu1 %vm970_vm1, %v6412_v46  ;;  %5221 = vmatprep.mubr.msk.bf16.mxu0 %vm970_vm1, %v6415_v47 }
  0xfd   : > { %5311 = vmatprep.mubr.msk.bf16.mxu1 %vm970_vm1, %v6418_v48 }
 0x103   : > { %5222 = vmatmul.mubr.msk.bf16.vlgmr.msra.gmra.mrb[8].mxu0 %vm970_vm1, %v6429_v49 }
 0x104   : > { %5230 = vmatpush3.bf16.msra.mxu0 %v6298_v30  ;;  %5312 = vmatmul.mubr.msk.bf16.vlgmr.msra.gmra.mrb[8].mxu1 %vm970_vm1, %v6432_v50 }
 0x105   : > { %5320 = vmatpush3.bf16.msra.mxu1 %v6298_v30  ;;  %5225 = vmatprep.mubr.msk.bf16.mxu0 %vm970_vm1, %v6439_v52 }
 0x106   : > { %5315 = vmatprep.mubr.msk.bf16.mxu1 %vm970_vm1, %v6442_v53  ;;  %5648 = vmatprep.subr.msk.bf16.mxu0 %vm983_vm0, %v6306_v32 }
 0x107   : > { %5657 = vmatprep.subr.msk.bf16.mxu1 %vm983_vm0, %v6306_v32 }
 0x10b   : > { %5226 = vmatmul.mubr.msk.bf16.gmra.mrb[12].mxu0 %vm970_vm1, %v6462_v55 }
 0x10c   : > { %5316 = vmatmul.mubr.msk.bf16.gmra.mrb[12].mxu1 %vm970_vm1, %v6467_v56  ;;  %5231 = vmatprep.mubr.msk.bf16.mxu0 %vm970_vm1, %v6418_v48 }
 0x10d   : > { %5321 = vmatprep.mubr.msk.bf16.mxu1 %vm970_vm1, %v6470_v57 }
 0x113   : > { %5232 = vmatmul.mubr.msk.bf16.vlgmr.msra.gmra.mrb[8].mxu0 %vm970_vm1, %v6432_v50 }
 0x114   : > { %5240 = vmatpush3.bf16.msra.mxu0 %v6344_v37  ;;  %5322 = vmatmul.mubr.msk.bf16.vlgmr.msra.gmra.mrb[8].mxu1 %vm970_vm1, %v6481_v58 }
 0x115   : > { %5330 = vmatpush3.bf16.msra.mxu1 %v6344_v37  ;;  %5235 = vmatprep.mubr.msk.bf16.mxu0 %vm970_vm1, %v6442_v53 }
 0x116   : > { %5325 = vmatprep.mubr.msk.bf16.mxu1 %vm970_vm1, %v6488_v60  ;;  %5649 = vmatprep.subr.msk.bf16.mxu0 %vm983_vm0, %v6354_v39 }
 0x117   : > { %5658 = vmatprep.subr.msk.bf16.mxu1 %vm983_vm0, %v6354_v39 }
 0x11b   : > { %5236 = vmatmul.mubr.msk.bf16.gmra.mrb[12].mxu0 %vm970_vm1, %v6467_v56 }
 0x11c   : > { %5326 = vmatmul.mubr.msk.bf16.gmra.mrb[12].mxu1 %vm970_vm1, %v6505_v61  ;;  %5241 = vmatprep.mubr.msk.bf16.mxu0 %vm970_vm1, %v6470_v57 }
 0x11d   : > { %5331 = vmatprep.mubr.msk.bf16.mxu1 %vm970_vm1, %v6508_v62 }
 0x123   : > { %5242 = vmatmul.mubr.msk.bf16.vlgmr.msra.gmra.mrb[8].mxu0 %vm970_vm1, %v6481_v58 }
 0x124   : > { %5250 = vmatpush3.bf16.msra.mxu0 %v6387_v43  ;;  %5332 = vmatmul.mubr.msk.bf16.vlgmr.msra.gmra.mrb[8].mxu1 %vm970_vm1, %v6519_v63 }
 0x125   : > { %5340 = vmatpush3.bf16.msra.mxu1 %v6387_v43  ;;  %5245 = vmatprep.mubr.msk.bf16.mxu0 %vm970_vm1, %v6488_v60 }
 0x126   : > { %5335 = vmatprep.mubr.msk.bf16.mxu1 %vm970_vm1, %v6522_v0  ;;  %5650 = vmatprep.subr.msk.bf16.mxu0 %vm983_vm0, %v6397_v45 }
 0x127   : > { %5659 = vmatprep.subr.msk.bf16.mxu1 %vm983_vm0, %v6397_v45 }
 0x12b   : > { %5246 = vmatmul.mubr.msk.bf16.gmra.mrb[12].mxu0 %vm970_vm1, %v6505_v61 }
 0x12c   : > { %5336 = vmatmul.mubr.msk.bf16.gmra.mrb[12].mxu1 %vm970_vm1, %v6539_v3  ;;  %5251 = vmatprep.mubr.msk.bf16.mxu0 %vm970_vm1, %v5776_v1 }
 0x12d   : > { %5341 = vmatprep.mubr.msk.bf16.mxu1 %vm970_vm1, %v5777_v2 }
 0x133   : > { %5252 = vmatmul.mubr.msk.bf16.vlgmr.msra.gmra.mrb[8].mxu0 %vm970_vm1, %v5778_v4 }
 0x134   : > { %5260 = vmatpush3.bf16.msra.mxu0 %v6436_v51  ;;  %5342 = vmatmul.mubr.msk.bf16.vlgmr.msra.gmra.mrb[8].mxu1 %vm970_vm1, %v5779_v5 }
 0x135   : > { %5350 = vmatpush3.bf16.msra.mxu1 %v6436_v51  ;;  %5255 = vmatprep.mubr.msk.bf16.mxu0 %vm970_vm1, %v5780_v6 }
 0x136   : > { %5345 = vmatprep.mubr.msk.bf16.mxu1 %vm970_vm1, %v5781_v7  ;;  %5651 = vmatprep.subr.msk.bf16.mxu0 %vm983_vm0, %v6449_v54 }
 0x137   : > { %5660 = vmatprep.subr.msk.bf16.mxu1 %vm983_vm0, %v6449_v54 }
 0x13b   : > { %5256 = vmatmul.mubr.msk.bf16.gmra.mrb[12].mxu0 %vm970_vm1, %v5782_v8 }
 0x13c   : > { %5346 = vmatmul.mubr.msk.bf16.gmra.mrb[12].mxu1 %vm970_vm1, %v5783_v9  ;;  %5261 = vmatprep.mubr.msk.bf16.mxu0 %vm970_vm1, %v5777_v2 }
 0x13d   : > { %5351 = vmatprep.mubr.msk.bf16.mxu1 %vm970_vm1, %v5784_v10 }
 0x143   : > { %5262 = vmatmul.mubr.msk.bf16.vlgmr.msra.gmra.mrb[8].mxu0 %vm970_vm1, %v5779_v5 }
 0x144   : > { %5270 = vmatpush3.bf16.msra.mxu0 %v6485_v59  ;;  %5352 = vmatmul.mubr.msk.bf16.vlgmr.msra.gmra.mrb[8].mxu1 %vm970_vm1, %v5785_v11 }
 0x145   : > { %5360 = vmatpush3.bf16.msra.mxu1 %v6485_v59  ;;  %5265 = vmatprep.mubr.msk.bf16.mxu0 %vm970_vm1, %v5781_v7 }
 0x146   : > { %5355 = vmatprep.mubr.msk.bf16.mxu1 %vm970_vm1, %v5786_v12 }
 0x14b   : > { %5266 = vmatmul.mubr.msk.bf16.gmra.mrb[12].mxu0 %vm970_vm1, %v5783_v9 }
 0x14c   : > { %5356 = vmatmul.mubr.msk.bf16.gmra.mrb[12].mxu1 %vm970_vm1, %v5787_v13  ;;  %5271 = vmatprep.mubr.msk.bf16.mxu0 %vm970_vm1, %v5784_v10 }
 0x14d   : > { %5361 = vmatprep.mubr.msk.bf16.mxu1 %vm970_vm1, %v5788_v14 }
 0x153   : > { %5272 = vmatmul.mubr.msk.bf16.vlgmr.msra.gmra.mrb[8].mxu0 %vm970_vm1, %v5785_v11 }
 0x154   : > { %5362 = vmatmul.mubr.msk.bf16.vlgmr.msra.gmra.mrb[8].mxu1 %vm970_vm1, %v5789_v15  ;;  %5275 = vmatprep.mubr.msk.bf16.mxu0 %vm970_vm1, %v5786_v12 }
 0x155   : > { %5365 = vmatprep.mubr.msk.bf16.mxu1 %vm970_vm1, %v5790_v16 }
 0x15b   : > { %5276 = vmatmul.mubr.msk.bf16.gmra.mrb[12].mxu0 %vm970_vm1, %v5787_v13 }
 0x15c   : > { %5366 = vmatmul.mubr.msk.bf16.gmra.mrb[12].mxu1 %vm970_vm1, %v5791_v17 }
 0x196   : > { %v6725_v18 = vpop.f32.mrb[0].mxu0 }
 0x197   : > { %v6727_v19 = vpop.f32.mrb[0].mxu1  ;;  %v6729_v20 = vpop.f32.mrb[1].mxu0  ;;  %v1923_v41 = vmul.f32 %v6725_v18, %v6725_v18 }
 0x198   : > { %v2681_v21 = vmax.f32 %v6725_v18, %v6727_v19  ;;  %v2689_v22 = vmin.f32 %v6725_v18, %v6727_v19  ;;  %v6735_v23 = vpop.f32.mrb[1].mxu1  ;;  %v6737_v24 = vpop.f32.mrb[2].mxu0  ;;  %v1921_v29 = vmul.f32 %v6729_v20, %v6729_v20  ;;  %v2710_v44 = vmul.f32 %v6727_v19, %v6727_v19 }
 0x199   : > { %v2679_v25 = vmax.f32 %v6729_v20, %v6735_v23  ;;  %v2687_v26 = vmin.f32 %v6729_v20, %v6735_v23  ;;  %v6743_v27 = vpop.f32.mrb[2].mxu1  ;;  %v6745_v28 = vpop.f32.mrb[3].mxu0  ;;  %v2708_v38 = vmul.f32 %v6735_v23, %v6735_v23  ;;  %v1924_v48 = vmul.f32 %v6737_v24, %v6737_v24 }
 0x19a   : > { %v2682_v30 = vmax.f32 %v6737_v24, %v6743_v27  ;;  %v2690_v31 = vmin.f32 %v6737_v24, %v6743_v27  ;;  %v1908_v32 = vadd.f32 %v6745_v28, %v6729_v20  ;;  %v6755_v33 = vpop.f32.mrb[3].mxu1  ;;  %v1922_v34 = vmul.f32 %v6745_v28, %v6745_v28 }
 0x19b   : > { %v2680_v35 = vmax.f32 %v6745_v28, %v6755_v33  ;;  %v2688_v36 = vmin.f32 %v6745_v28, %v6755_v33  ;;  %v2695_v37 = vadd.f32 %v6755_v33, %v6735_v23  ;;  %v2709_v40 = vmul.f32 %v6755_v33, %v6755_v33 }
 0x19c   : > { %v1909_v39 = vadd.f32 %v6725_v18, %v1908_v32  ;;  %v1929_v42 = vadd.f32 %v1922_v34, %v1921_v29  ;;  %v2711_v53 = vmul.f32 %v6743_v27, %v6743_v27 }
 0x19d   : > { %v2696_v43 = vadd.f32 %v6727_v19, %v2695_v37  ;;  %v2716_v45 = vadd.f32 %v2709_v40, %v2708_v38 }
 0x19e   : > { %v6775_v46 = vpop.f32.mrb[4].mxu0  ;;  %v1910_v47 = vadd.f32 %v6737_v24, %v1909_v39  ;;  %v1930_v49 = vadd.f32 %v1929_v42, %v1923_v41 }
 0x19f   : > { %v6780_v50 = vpop.f32.mrb[4].mxu1  ;;  %v6782_v51 = vpop.f32.mrb[5].mxu0  ;;  %v2697_v52 = vadd.f32 %v6743_v27, %v2696_v43  ;;  %v2717_v54 = vadd.f32 %v2716_v45, %v2710_v44  ;;  %v1927_v16 = vmul.f32 %v6775_v46, %v6775_v46 }
 0x1a0   : > { %v2685_v55 = vmax.f32 %v6775_v46, %v6780_v50  ;;  %v2693_v56 = vmin.f32 %v6775_v46, %v6780_v50  ;;  %v6791_v57 = vpop.f32.mrb[5].mxu1  ;;  %v6793_v58 = vpop.f32.mrb[6].mxu0  ;;  %v1911_v59 = vadd.f32 %v1910_v47, %v6782_v51  ;;  %v1925_v60 = vmul.f32 %v6782_v51, %v6782_v51 }
 0x1a1   : > { %v1931_v61 = vadd.f32 %v1930_v49, %v1924_v48  ;;  %v2683_v62 = vmax.f32 %v6782_v51, %v6791_v57  ;;  %v6800_v63 = vpop.f32.mrb[6].mxu1  ;;  %v6802_v0 = vpop.f32.mrb[7].mxu0  ;;  %v2691_v3 = vmin.f32 %v6782_v51, %v6791_v57  ;;  %v2698_v1 = vadd.f32 %v2697_v52, %v6791_v57 }
 0x1a2   : > { %v2712_v2 = vmul.f32 %v6791_v57, %v6791_v57  ;;  %v2718_v4 = vadd.f32 %v2717_v54, %v2711_v53  ;;  %v6809_v5 = vpop.f32.mrb[7].mxu1  ;;  %v2686_v7 = vmax.f32 %v6793_v58, %v6800_v63  ;;  %v2694_v8 = vmin.f32 %v6793_v58, %v6800_v63 }
 0x1a3   : > { %v1932_v6 = vadd.f32 %v1931_v61, %v1925_v60  ;;  %v1912_v10 = vadd.f32 %v1911_v59, %v6802_v0  ;;  %v1926_v11 = vmul.f32 %v6802_v0, %v6802_v0  ;;  %v2699_v12 = vadd.f32 %v2698_v1, %v6809_v5 }
 0x1a4   : > { %v2719_v9 = vadd.f32 %v2718_v4, %v2712_v2  ;;  %v2713_v13 = vmul.f32 %v6809_v5, %v6809_v5  ;;  %v2684_v14 = vmax.f32 %v6802_v0, %v6809_v5  ;;  %v2692_v15 = vmin.f32 %v6802_v0, %v6809_v5 }
 0x1a5   : > { %v1913_v17 = vadd.f32 %v6775_v46, %v1912_v10  ;;  %v1933_v29 = vadd.f32 %v1932_v6, %v1926_v11  ;;  %v2714_v32 = vmul.f32 %v6780_v50, %v6780_v50  ;;  %v2700_v34 = vadd.f32 %v6780_v50, %v2699_v12 }
 0x1a6   : > { %v2720_v37 = vadd.f32 %v2719_v9, %v2713_v13  ;;  %v1928_v38 = vmul.f32 %v6793_v58, %v6793_v58  ;;  %v2715_v41 = vmul.f32 %v6800_v63, %v6800_v63 }
 0x1a7   : > { %v1914_v39 = vadd.f32 %v6793_v58, %v1913_v17  ;;  %v1934_v40 = vadd.f32 %v1933_v29, %v1927_v16  ;;  %v2701_v42 = vadd.f32 %v6800_v63, %v2700_v34 }
 0x1a8   : > { %v2721_v43 = vadd.f32 %v2720_v37, %v2714_v32 }
 0x1a9   : > { %v1915_v44 = vrot.slane %v1914_v39, 4  ;;  %v1935_v45 = vadd.f32 %v1934_v40, %v1928_v38  ;;  %v2702_v47 = vrot.slane %v2701_v42, 4 }
 0x1aa   : > { %v2722_v48 = vadd.f32 %v2721_v43, %v2715_v41 }
 0x1ab   : > { %v1916_v49 = vadd.f32 %v1915_v44, %v1914_v39  ;;  %v1936_v52 = vrot.slane %v1935_v45, 4  ;;  %v2703_v53 = vadd.f32 %v2702_v47, %v2701_v42 }
 0x1ac   : > { %v2723_v54 = vrot.slane %v2722_v48, 4 }
 0x1ad   : > { %v1917_v59 = vrot.slane %v1916_v49, 2  ;;  %v1937_v60 = vadd.f32 %v1936_v52, %v1935_v45  ;;  %v2704_v61 = vrot.slane %v2703_v53, 2 }
 0x1ae   : > { %v2724_v1 = vadd.f32 %v2723_v54, %v2722_v48 }
 0x1af   : > { %v1918_v2 = vadd.f32 %v1917_v59, %v1916_v49  ;;  %v1938_v4 = vrot.slane %v1937_v60, 2  ;;  %v2705_v6 = vadd.f32 %v2704_v61, %v2703_v53 }
 0x1b0   : > { %v2725_v9 = vrot.slane %v2724_v1, 2 }
 0x1b1   : > { %v1919_v10 = vrot.slane %v1918_v2, 1  ;;  %v1939_v11 = vadd.f32 %v1938_v4, %v1937_v60  ;;  %v2706_v12 = vrot.slane %v2705_v6, 1 }
 0x1b2   : > { %v2726_v13 = vadd.f32 %v2725_v9, %v2724_v1 }
 0x1b3   : > { %v1920_v16 = vadd.f32 %v1919_v10, %v1918_v2  ;;  %v1940_v17 = vrot.slane %v1939_v11, 1  ;;  %v2707_v29 = vadd.f32 %v2706_v12, %v2705_v6 }
 0x1b4   : > { %v2727_v32 = vrot.slane %v2726_v13, 1 }
 0x1b5   : > { %v1941_v34 = vadd.f32 %v1940_v17, %v1939_v11  ;;  %v6837_v38 = vadd.f32 %v2707_v29, %v1920_v16 }
 0x1b6   : > { %v2728_v37 = vadd.f32 %v2727_v32, %v2726_v13 }
 0x1b8   : > { %v6839_v39 = vadd.f32 %v2728_v37, %v1941_v34 }
 0x226   : > { %v5273_v40 = vpop.f32.mrb[8].mxu0 }
 0x227   : > { %v3470_v41 = vmax.f32 %v2681_v21, %v5273_v40  ;;  %v3478_v42 = vmin.f32 %v2689_v22, %v5273_v40  ;;  %v5363_v43 = vpop.f32.mrb[8].mxu1  ;;  %v3429_v44 = vpop.f32.mrb[9].mxu0 }
 0x228   : > { %v3468_v45 = vmax.f32 %v2679_v25, %v3429_v44  ;;  %v3476_v47 = vmin.f32 %v2687_v26, %v3429_v44  ;;  %v4154_v48 = vpop.f32.mrb[9].mxu1  ;;  %v6854_v49 = vpop.f32.mrb[10].mxu0  ;;  %v3497_v25 = vmul.f32 %v3429_v44, %v3429_v44  ;;  %v4224_v9 = vmul.f32 %v5363_v43, %v5363_v43 }
 0x229   : > { %v4195_v52 = vmax.f32 %v3470_v41, %v5363_v43  ;;  %v4203_v53 = vmin.f32 %v3478_v42, %v5363_v43  ;;  %v3471_v18 = vmax.f32 %v2682_v30, %v6854_v49  ;;  %v6860_v19 = vpop.f32.mrb[10].mxu1  ;;  %v3432_v21 = vpop.f32.mrb[11].mxu0  ;;  %v3479_v20 = vmin.f32 %v2690_v31, %v6854_v49 }
 0x22a   : > { %v4193_v22 = vmax.f32 %v3468_v45, %v4154_v48  ;;  %v4201_v54 = vmin.f32 %v3476_v47, %v4154_v48  ;;  %v4157_v23 = vpop.f32.mrb[11].mxu1  ;;  %v3469_v24 = vmax.f32 %v2680_v35, %v3432_v21  ;;  %v3477_v27 = vmin.f32 %v2688_v36, %v3432_v21 }
 0x22b   : > { %4247 = vst [vmem:[%s6866_s5 + $0x10] sm:$0xff] %v4195_v52  ;;  %4255 = vst [vmem:[%s6869_s6 + $0x10] sm:$0xff] %v4203_v53  ;;  %v4196_v26 = vmax.f32 %v3471_v18, %v6860_v19  ;;  %v4204_v30 = vmin.f32 %v3479_v20, %v6860_v19  ;;  %v3484_v31 = vadd.f32 %v3432_v21, %v3429_v44 }
 0x22c   : > { %4245 = vst [vmem:[%s6866_s5] sm:$0xff] %v4193_v22  ;;  %4253 = vst [vmem:[%s6869_s6] sm:$0xff] %v4201_v54  ;;  %v3498_v59 = vmul.f32 %v3432_v21, %v3432_v21  ;;  %v4209_v60 = vadd.f32 %v4157_v23, %v4154_v48  ;;  %v4222_v61 = vmul.f32 %v4154_v48, %v4154_v48 }
 0x22d   : > { %4248 = vst [vmem:[%s6866_s5 + $0x18] sm:$0xff] %v4196_v26  ;;  %v4194_v1 = vmax.f32 %v3469_v24, %v4157_v23  ;;  %v4202_v2 = vmin.f32 %v3477_v27, %v4157_v23  ;;  %v4223_v4 = vmul.f32 %v4157_v23, %v4157_v23  ;;  %v3499_v35 = vmul.f32 %v5273_v40, %v5273_v40 }
 0x22e   : > { %4256 = vst [vmem:[%s6869_s6 + $0x18] sm:$0xff] %v4204_v30  ;;  %v3485_v6 = vadd.f32 %v5273_v40, %v3484_v31  ;;  %v3505_v28 = vadd.f32 %v3498_v59, %v3497_v25  ;;  %v4210_v33 = vadd.f32 %v5363_v43, %v4209_v60  ;;  %v6884_v36 = vpop.f32.mrb[12].mxu0  ;;  %v4225_v57 = vmul.f32 %v6860_v19, %v6860_v19 }
 0x22f   : > { %v4230_v10 = vadd.f32 %v4223_v4, %v4222_v61  ;;  %4246 = vst [vmem:[%s6866_s5 + $0x8] sm:$0xff] %v4194_v1  ;;  %4254 = vst [vmem:[%s6869_s6 + $0x8] sm:$0xff] %v4202_v2  ;;  %v3474_v11 = vmax.f32 %v2685_v55, %v6884_v36  ;;  %v3482_v12 = vmin.f32 %v2693_v56, %v6884_v36  ;;  %v6896_v13 = vpop.f32.mrb[12].mxu1  ;;  %v3445_v16 = vpop.f32.mrb[13].mxu0 }
 0x230   : > { %v3506_v17 = vadd.f32 %v3505_v28, %v3499_v35  ;;  %v3472_v29 = vmax.f32 %v2683_v62, %v3445_v16  ;;  %v3480_v55 = vmin.f32 %v2691_v3, %v3445_v16  ;;  %v4170_v46 = vpop.f32.mrb[13].mxu1  ;;  %v6908_v50 = vpop.f32.mrb[14].mxu0  ;;  %v3500_v56 = vmul.f32 %v6854_v49, %v6854_v49 }
 0x231   : > { %v4231_v32 = vadd.f32 %v4230_v10, %v4224_v9  ;;  %v4199_v34 = vmax.f32 %v3474_v11, %v6896_v13  ;;  %v4207_v37 = vmin.f32 %v3482_v12, %v6896_v13  ;;  %v6914_v62 = vpop.f32.mrb[14].mxu1  ;;  %v3448_v51 = vpop.f32.mrb[15].mxu0  ;;  %v3475_v41 = vmax.f32 %v2686_v7, %v6908_v50 }
 0x232   : > { %v4197_v3 = vmax.f32 %v3472_v29, %v4170_v46  ;;  %v4205_v40 = vmin.f32 %v3480_v55, %v4170_v46  ;;  %v6923_v42 = vpop.f32.mrb[15].mxu1  ;;  %v3501_v43 = vmul.f32 %v3445_v16, %v3445_v16  ;;  %v4226_v44 = vmul.f32 %v4170_v46, %v4170_v46 }
 0x233   : > { %4251 = vst [vmem:[%s6866_s5 + $0x30] sm:$0xff] %v4199_v34  ;;  %4259 = vst [vmem:[%s6869_s6 + $0x30] sm:$0xff] %v4207_v37  ;;  %v3483_v45 = vmin.f32 %v2694_v8, %v6908_v50  ;;  %v3473_v47 = vmax.f32 %v2684_v14, %v3448_v51  ;;  %v4200_v7 = vmax.f32 %v3475_v41, %v6914_v62 }
 0x234   : > { %4249 = vst [vmem:[%s6866_s5 + $0x20] sm:$0xff] %v4197_v3  ;;  %4257 = vst [vmem:[%s6869_s6 + $0x20] sm:$0xff] %v4205_v40  ;;  %v3481_v48 = vmin.f32 %v2692_v15, %v3448_v51  ;;  %v3486_v52 = vadd.f32 %v6854_v49, %v3485_v6  ;;  %v3502_v58 = vmul.f32 %v3448_v51, %v3448_v51 }
 0x235   : > { %v4208_v63 = vmin.f32 %v3483_v45, %v6914_v62  ;;  %v3507_v8 = vadd.f32 %v3506_v17, %v3500_v56  ;;  %v4198_v14 = vmax.f32 %v3473_v47, %v6923_v42  ;;  %v4211_v53 = vadd.f32 %v6860_v19, %v4210_v33  ;;  %4252 = vst [vmem:[%s6866_s5 + $0x38] sm:$0xff] %v4200_v7 }
 0x236   : > { %v3487_v0 = vadd.f32 %v3486_v52, %v3445_v16  ;;  %v4206_v5 = vmin.f32 %v3481_v48, %v6923_v42  ;;  %v6959_v15 = vmul.f32 %v6923_v42, %v6923_v42  ;;  %v4232_v49 = vadd.f32 %v4231_v32, %v4225_v57 }
 0x237   : > { %4260 = vst [vmem:[%s6869_s6 + $0x38] sm:$0xff] %v4208_v63  ;;  %v3508_v18 = vadd.f32 %v3507_v8, %v3501_v43  ;;  %v4212_v19 = vadd.f32 %v4211_v53, %v4170_v46  ;;  %4250 = vst [vmem:[%s6866_s5 + $0x28] sm:$0xff] %v4198_v14 }
 0x238   : > { %v6972_v21 = vadd.f32 %v3487_v0, %v3448_v51  ;;  %v6974_v22 = vadd.f32 %v4232_v49, %v4226_v44  ;;  %4258 = vst [vmem:[%s6869_s6 + $0x28] sm:$0xff] %v4206_v5 }
 0x239   : > { %5805 = shalt.err (!%p5802_p7)
}
 0x23a   : > { %s5806_s5 = scalar_lea.hbm %s6951_s13, 1024  ;;  %s5810_s24 = scalar_lea.hbm %s7108_s2, 2048 }
 0x23b   : > { %p5807_p8 = scmp.ne.s32.totalorder %s6951_s13, %s5806_s5  ;;  %p5811_p13 = scmp.lt.u32.totalorder %s6951_s13, %s7108_s2 }
 0x23c   : > { %p5812_p0 = scmp.lt.u32.totalorder %s5810_s24, %s5806_s5  ;;  %p5814_p2 = scmp.lt.u32.totalorder %s5806_s5, %s6951_s13 }
 0x23d   : > { %p5808_p11 = pnand %p5807_p8, %p6003_p5 }
 0x23e   : > { %p5813_p1 = por %p5812_p0, %p5811_p13 }
 0x23f   : > { %p5809_p12 = pneg %p5808_p11 }
 0x240   : > { %p5815_p3 = por %p5814_p2, %p5813_p1 }
 0x242   : > { %p5816_p4 = pnand %p5815_p3, %p5809_p12 }
 0x244   : > { %5819 = shalt.err (!%p5816_p4)
}
 0x245   : > { %s5933_s26 = smov 128   ;;  %s5934_s11 = smov 8   ;;  %v3503_v54 = vmul.f32 %v6884_v36, %v6884_v36  ;;  %v3509_v20 = vadd.f32 %v3508_v18, %v3502_v58  ;;  %v4213_v23 = vadd.f32 %v4212_v19, %v6923_v42 }
 0x246   : > { %5661 = dma.vmem_to_hbm [thread:$0]  (%p6003_p5), %s6953_s8, 1024, %s6951_s13, %s4264_s30, %s5933_s26, %s5933_s26, %s5934_s11  }
 0x247   : > { %s4269_s5 = scalar_lea.sflag [#allocation6], %s6900_s7  ;;  %s5820_s6 = scalar_lea.vmem %s6968_s9, 1024 }
 0x248   : > { %p5821_p6 = scmp.ne.s32.totalorder %s6968_s9, %s5820_s6  ;;  %s5935_s14 = smov [#allocation5]  }
 0x249   : > { %s5824_s24 = sshll.u32 %s5935_s14, 4  ;;  %s5825_s24 = int_to_ptr.vmem [resolvable:$false] %s5824_s24 }
 0x24a   : > { %p5822_p7 = pnand %p5821_p6, %p6003_p5  ;;  %s5826_s21 = scalar_lea.vmem %s5825_s24, 2048 }
 0x24b   : > { %p5827_p11 = scmp.lt.s32.totalorder %s6968_s9, %s5825_s24  ;;  %p5828_p12 = scmp.lt.s32.totalorder %s5826_s21, %s5820_s6 }
 0x24c   : > { %p5823_p8 = pneg %p5822_p7 }
 0x24d   : > { %p5829_p13 = por %p5828_p12, %p5827_p11 }
 0x24f   : > { %p5830_p0 = pnand %p5829_p13, %p5823_p8 }
 0x251   : > { %5833 = shalt.err (!%p5830_p0)
}
 0x252   : > { %s5834_s8 = scalar_lea.hbm %s6966_s29, 1024  ;;  %s5838_s10 = scalar_lea.hbm %s7109_s3, 2048 }
 0x253   : > { %p5835_p1 = scmp.ne.s32.totalorder %s6966_s29, %s5834_s8  ;;  %p5839_p4 = scmp.lt.u32.totalorder %s6966_s29, %s7109_s3 }
 0x254   : > { %p5840_p6 = scmp.lt.u32.totalorder %s5838_s10, %s5834_s8  ;;  %p5842_p8 = scmp.lt.u32.totalorder %s5834_s8, %s6966_s29 }
 0x255   : > { %p5836_p2 = pnand %p5835_p1, %p6003_p5 }
 0x256   : > { %p5841_p7 = por %p5840_p6, %p5839_p4 }
 0x257   : > { %p5837_p3 = pneg %p5836_p2 }
 0x258   : > { %p5843_p11 = por %p5842_p8, %p5841_p7 }
 0x25a   : > { %p5844_p12 = pnand %p5843_p11, %p5837_p3 }
 0x25c   : > { %5847 = shalt.err (!%p5844_p12)
}
 0x25d   : > { %5662 = dma.vmem_to_hbm [thread:$0]  (%p6003_p5), %s6968_s9, 1024, %s6966_s29, %s4269_s5, %s5933_s26, %s5933_s26, %s5934_s11   ;;  %v4228_v25 = vmul.f32 %v6896_v13, %v6896_v13  ;;  %v3489_v26 = vadd.f32 %v6884_v36, %v6972_v21  ;;  %v4234_v24 = vadd.f32 %v6974_v22, %v6959_v15  ;;  %v3504_v27 = vmul.f32 %v6908_v50, %v6908_v50 }
 0x25e   : > { %v3510_v30 = vadd.f32 %v3509_v20, %v3503_v54  ;;  %v4214_v31 = vadd.f32 %v6896_v13, %v4213_v23  ;;  %v4229_v59 = vmul.f32 %v6914_v62, %v6914_v62  ;;  %s4479_s9 = sshll.u32 %s6168_s12, 1  ;;  %s4823_s29 = sshll.u32 %s5922_s18, 5 }
 0x25f   : > { %v3490_v60 = vadd.f32 %v6908_v50, %v3489_v26  ;;  %v4235_v61 = vadd.f32 %v4234_v24, %v4228_v25  ;;  %s785_s26 = scalar_lea.vmem [#allocation7], %s4479_s9  ;;  %s7054_s21 = scalar_lea.hbm %s7110_s4, %s4823_s29 }
 0x260   : > { %v3511_v1 = vadd.f32 %v3510_v30, %v3504_v27  ;;  %v4215_v2 = vadd.f32 %v6914_v62, %v4214_v31  ;;  %s4324_s11 = sshll.u32 %s785_s26, 4  ;;  %s5936_s8 = smov [#allocation7]   ;;  %s7056_s11 = int_to_ptr.vmem [resolvable:$true] %s4324_s11 }
 0x261   : > { %v3491_v4 = vrot.slane %v3490_v60, 4  ;;  %v4236_v35 = vadd.f32 %v4235_v61, %v4229_v59  ;;  %s5848_s18 = scalar_lea.vmem %s7056_s11, 32  ;;  %s5852_s13 = sshll.u32 %s5936_s8, 4  ;;  %s5853_s13 = int_to_ptr.vmem [resolvable:$false] %s5852_s13 }
 0x262   : > { %v3512_v6 = vrot.slane %v3511_v1, 4  ;;  %v4216_v28 = vrot.slane %v4215_v2, 4  ;;  %p5849_p13 = scmp.ne.s32.totalorder %s7056_s11, %s5848_s18  ;;  %s5854_s30 = scalar_lea.vmem %s5853_s13, 64 }
 0x263   : > { %v3492_v33 = vadd.f32 %v3491_v4, %v3490_v60  ;;  %v4237_v36 = vrot.slane %v4236_v35, 4  ;;  %p5855_p2 = scmp.lt.s32.totalorder %s7056_s11, %s5853_s13  ;;  %p5856_p3 = scmp.lt.s32.totalorder %s5854_s30, %s5848_s18 }
 0x264   : > { %v3513_v9 = vadd.f32 %v3512_v6, %v3511_v1  ;;  %v4217_v10 = vadd.f32 %v4216_v28, %v4215_v2  ;;  %p5850_p0 = pnand %p5849_p13, %p6003_p5 }
 0x265   : > { %v3493_v11 = vrot.slane %v3492_v33, 2  ;;  %v4238_v12 = vadd.f32 %v4237_v36, %v4236_v35  ;;  %p5857_p4 = por %p5856_p3, %p5855_p2 }
 0x266   : > { %v3514_v13 = vrot.slane %v3513_v9, 2  ;;  %v4218_v16 = vrot.slane %v4217_v10, 2  ;;  %p5851_p1 = pneg %p5850_p0 }
 0x267   : > { %v3494_v17 = vadd.f32 %v3493_v11, %v3492_v33  ;;  %v4239_v29 = vrot.slane %v4238_v12, 2 }
 0x268   : > { %v3515_v55 = vadd.f32 %v3514_v13, %v3513_v9  ;;  %v4219_v46 = vadd.f32 %v4218_v16, %v4217_v10  ;;  %p5858_p6 = pnand %p5857_p4, %p5851_p1 }
 0x269   : > { %v3495_v50 = vrot.slane %v3494_v17, 1  ;;  %v4240_v56 = vadd.f32 %v4239_v29, %v4238_v12 }
 0x26a   : > { %v3516_v32 = vrot.slane %v3515_v55, 1  ;;  %v4220_v34 = vrot.slane %v4219_v46, 1 }
 0x26b   : > { %v3496_v37 = vadd.f32 %v3495_v50, %v3494_v17  ;;  %v4241_v62 = vrot.slane %v4240_v56, 1 }
 0x26c   : > { %v3517_v51 = vadd.f32 %v3516_v32, %v3515_v55  ;;  %v4221_v3 = vadd.f32 %v4220_v34, %v4219_v46 }
 0x26d   : > { %v3518_v57 = vadd.f32 %v3496_v37, %v6837_v38  ;;  %v4242_v41 = vadd.f32 %v4241_v62, %v4240_v56 }
 0x26e   : > { %v3519_v40 = vadd.f32 %v3517_v51, %v6839_v39 }
 0x26f   : > { %v4243_v42 = vadd.f32 %v4221_v3, %v3518_v57 }
 0x270   : > { %v4244_v43 = vadd.f32 %v4242_v41, %v3519_v40 }
 0x271   : > { %4261 = vst [vmem:[%s785_s26] sm:$0x1] %v4243_v42 }
 0x272   : > { %4262 = vst [vmem:[%s785_s26 + $0x1] sm:$0x1] %v4244_v43 }
 0x273   : > { %5861 = shalt.err (!%p5858_p6)
}
 0x274   : > { %s5862_s10 = scalar_lea.hbm %s7054_s21, 32  ;;  %s5866_s9 = scalar_lea.hbm %s7110_s4, 64 }
 0x275   : > { %p5863_p7 = scmp.ne.s32.totalorder %s7054_s21, %s5862_s10  ;;  %p5867_p12 = scmp.lt.u32.totalorder %s7054_s21, %s7110_s4 }
 0x276   : > { %p5868_p13 = scmp.lt.u32.totalorder %s5866_s9, %s5862_s10  ;;  %p5870_p1 = scmp.lt.u32.totalorder %s5862_s10, %s7054_s21 }
 0x277   : > { %p5864_p8 = pnand %p5863_p7, %p6003_p5 }
 0x278   : > { %p5869_p0 = por %p5868_p13, %p5867_p12 }
 0x279   : > { %p5865_p11 = pneg %p5864_p8 }
 0x27a   : > { %p5871_p2 = por %p5870_p1, %p5869_p0 }
 0x27c   : > { %p5872_p3 = pnand %p5871_p2, %p5865_p11 }
 0x27e   : > { %5875 = shalt.err (!%p5872_p3)
}
 0x27f   : > { %5663 = dma.vmem_to_hbm [thread:$0]  (%p6003_p5), %s7056_s11, 32, %s7054_s21, %s4269_s5  }
 0x280 PF: > { %s4336_s12 = sand.u32 1, %s5910_s15   ;;  %p5668_p4 = pnand %p4471_p10, %p6016_p9 }
 0x281   : > { %s4337_s6 = scalar_lea.sflag [#allocation4], %s4336_s12 }
 0x282   : > { %5901 = dma.done.wait (!%p5668_p4), %s4337_s6, 1024  }
 0x283   : > { %5903 = vsyncadd (!%p5668_p4), %s4337_s6, 4294966272  ;;  %s4345_s18 = sand.u32 1, %s4469_s22  }
 0x284   : > { %s4346_s25 = scalar_lea.sflag [#allocation6], %s4345_s18 }
 0x285   : > { %5905 = dma.done.wait (!%p5668_p4), %s4346_s25, 1056  }
 0x286   : > { %5907 = vsyncadd (!%p5668_p4), %s4346_s25, 4294966240  ;;  %s21_s20 = sadd.s32 1, %s5930_s20   ;;  %s7113_s15 = smov %s5914_s16 }
 0x287   : > { %p18_p5 = scmp.ge.s32.totalorder %s21_s20, 4   ;;  %s7114_s16 = smov %s5918_s17 }
 0x288   : > { %s7115_s17 = smov %s6014_s27  ;;  %s7116_s18 = smov %s5926_s19 }
 0x289   : > { %s7117_s19 = smov %s7119_s23  ;;  %20 = sbr.rel (!%p18_p5) target bundleno = 6 (0x6), region = 164 }
 0x290   :  { %4360 = vsyncpa [#allocation4], 1 }
 0x291   :  { %4362 = vsyncpa [#allocation4 + $0x1], 1 }
 0x292   :  { %4363 = vsyncpa [#allocation6], 1 }
 0x293   :  { %4365 = vsyncpa [#allocation6 + $0x1], 1 }

</bundles_post_ra>
